<compile_context>
chip_gen: v5e
topology: v5e:2x2
jax: 0.10.0
libtpu: 0.0.40
codegen_flags: <defaults>
</compile_context>

<pallas_src>
import jax
import jax.numpy as jnp
import numpy as np
from jax.experimental import pallas as pl
from jax.experimental.pallas import tpu as pltpu


def bond_angle_rbf_kernel(x_ref, centers_ref, neg_gamma_ref, w_ref, b_ref, out_ref):
    x = x_ref[...]                                       # (TILE_N, 1) f32
    diff = x - centers_ref[...]                          # (TILE_N, K) broadcast over lanes
    rbf = jnp.exp(neg_gamma_ref[...] * diff * diff)      # (TILE_N, K)  -- EUP exp
    acc = jnp.dot(rbf, w_ref[...],
                  preferred_element_type=jnp.float32)    # (TILE_N, E)  -- MXU
    out_ref[...] = (acc + b_ref[...]).astype(out_ref.dtype)


def bond_angle_float_rbf(bond_angle_float_features, fused_params, *, tile_n=1024):
    """Fused BondAngleFloatRBF forward.  Returns (N, embed_dim) float32."""
    x = bond_angle_float_features.reshape(-1, 1).astype(jnp.float32)
    n = x.shape[0]

    centers = fused_params["centers"]       # (1, K_total)
    neg_gamma = fused_params["neg_gamma"]   # (1, K_total)
    w = fused_params["w"]                   # (K_total, E)
    b = fused_params["b"]                   # (1, E)
    k = centers.shape[1]
    e = w.shape[1]

    # Row tile: multiple of 8 (sublane), no larger than needed for this N.
    tile_n = max(8, (int(tile_n) // 8) * 8)
    tile_n = min(tile_n, max(8, -(-n // 8) * 8))
    grid = (pl.cdiv(n, tile_n),)   # ragged last block: reads padded, writes masked

    cost = pl.CostEstimate(
        flops=2 * n * k * e + 4 * n * k,
        transcendentals=n * k,
        bytes_accessed=4 * (n * 1 + n * e + k * e + 2 * k + e),
    )

    out = pl.pallas_call(
        bond_angle_rbf_kernel,
        out_shape=jax.ShapeDtypeStruct((n, e), jnp.float32),
        grid=grid,
        in_specs=[
            pl.BlockSpec((tile_n, 1), lambda i: (i, 0)),   # x tile (streamed)
            pl.BlockSpec((1, k), lambda i: (0, 0)),        # centers (VMEM-resident)
            pl.BlockSpec((1, k), lambda i: (0, 0)),        # -gamma  (VMEM-resident)
            pl.BlockSpec((k, e), lambda i: (0, 0)),        # fused weight (VMEM-resident)
            pl.BlockSpec((1, e), lambda i: (0, 0)),        # fused bias   (VMEM-resident)
        ],
        out_specs=pl.BlockSpec((tile_n, e), lambda i: (i, 0)),  # lane-dense output tile
        compiler_params=pltpu.CompilerParams(
            dimension_semantics=("parallel",),
        ),
        cost_estimate=cost,
    )(x, centers, neg_gamma, w, b)

    return out


def make_params(key, names, rbf_params, embed_dim):
    """Deterministic synthetic weights.

    Per-name nn.Linear(K_name, embed_dim) weights are stored pre-transposed as
    (K_name, embed_dim).  Also builds the fused arrays used by the kernel:
    concatenated centers / -gamma along the RBF-feature axis, stacked weights
    along the in-feature axis, summed biases.
    """
    keys = jax.random.split(key, 2 * len(names))
    per_name = {}
    centers_list, neg_gamma_list, w_list = [], [], []
    b_sum = jnp.zeros((1, embed_dim), jnp.float32)
    for idx, name in enumerate(names):
        centers, gamma = rbf_params[name]
        centers = jnp.asarray(np.asarray(centers), jnp.float32).reshape(1, -1)
        k = centers.shape[1]
        bound = 1.0 / float(np.sqrt(k))
        w = jax.random.uniform(keys[2 * idx], (k, embed_dim), jnp.float32, -bound, bound)
        b = jax.random.uniform(keys[2 * idx + 1], (1, embed_dim), jnp.float32, -bound, bound)
        per_name[name] = (w, b)
        centers_list.append(centers)
        neg_gamma_list.append(jnp.full((1, k), -float(gamma), jnp.float32))
        w_list.append(w)
        b_sum = b_sum + b
    fused = {
        "centers": jnp.concatenate(centers_list, axis=1),
        "neg_gamma": jnp.concatenate(neg_gamma_list, axis=1),
        "w": jnp.concatenate(w_list, axis=0),
        "b": b_sum,
    }
    return fused, per_name


def reference_forward(x, names, rbf_params, per_name_params):
    """Pure-JAX mirror of the PyTorch module (eval mode)."""
    x = x.reshape(-1, 1).astype(jnp.float32)
    out = 0.0
    for name in names:
        centers, gamma = rbf_params[name]
        centers = jnp.asarray(np.asarray(centers), jnp.float32).reshape(1, -1)
        rbf_x = jnp.exp(-float(gamma) * jnp.square(x - centers))
        w, b = per_name_params[name]
        out = out + rbf_x @ w + b
    return out


if __name__ == "__main__":
    key = jax.random.PRNGKey(0)
    k_x, k_p = jax.random.split(key)

    # Module config matching the PyTorch defaults.
    names = ["bond_angle"]
    rbf_params = {"bond_angle": (np.arange(0, np.pi, 0.1), 10.0)}   # 32 centers, gamma=10
    embed_dim = 128                                                  # lane-dense output
    n = 2000                                                         # number of bond angles

    bond_angles = jax.random.uniform(k_x, (n,), jnp.float32, 0.0, float(np.pi))
    fused, per_name = make_params(k_p, names, rbf_params, embed_dim)

    # tile_n=1024 -> 2-step ragged grid: both v7x TensorCores busy, no pad/slice copies.
    out = bond_angle_float_rbf(bond_angles, fused, tile_n=1024)
    jax.block_until_ready(out)

    ref = reference_forward(bond_angles, names, rbf_params, per_name)
    assert out.shape == (n, embed_dim)
    err = float(jnp.max(jnp.abs(out - ref)))
    assert jnp.allclose(out, ref, atol=1e-5, rtol=1e-5), err

    print("KERNEL_OK")
</pallas_src>

<mosaic_0001>
module attributes {stable_mosaic.version = 11 : i64} {
  func.func @bond_angle_rbf_kernel(%arg0: i32, %arg1: memref<1024x1xf32, #tpu.memory_space<vmem>>, %arg2: memref<1x32xf32, #tpu.memory_space<vmem>>, %arg3: memref<1x32xf32, #tpu.memory_space<vmem>>, %arg4: memref<32x128xf32, #tpu.memory_space<vmem>>, %arg5: memref<1x128xf32, #tpu.memory_space<vmem>>, %arg6: memref<1024x128xf32, #tpu.memory_space<vmem>>) attributes {dimension_semantics = [#tpu.dimension_semantics<parallel>], iteration_bounds = array<i64: 2>, scalar_prefetch = 0 : i64, scratch_operands = 0 : i64, tpu.core_type = #tpu.core_type<tc>, window_params = [{transform_indices = @transform_0, window_bounds = array<i64: 1024, 1>}, {pipeline_mode = #tpu.pipeline_mode<synchronous>, transform_indices = @transform_1, window_bounds = array<i64: 1, 32>}, {pipeline_mode = #tpu.pipeline_mode<synchronous>, transform_indices = @transform_2, window_bounds = array<i64: 1, 32>}, {pipeline_mode = #tpu.pipeline_mode<synchronous>, transform_indices = @transform_3, window_bounds = array<i64: 32, 128>}, {pipeline_mode = #tpu.pipeline_mode<synchronous>, transform_indices = @transform_4, window_bounds = array<i64: 1, 128>}, {transform_indices = @transform_5, window_bounds = array<i64: 1024, 128>}]} {
    %c0 = arith.constant 0 : index
    %c0_0 = arith.constant 0 : index
    %0 = vector.load %arg1[%c0, %c0_0] : memref<1024x1xf32, #tpu.memory_space<vmem>>, vector<1024x1xf32>
    %c0_1 = arith.constant 0 : index
    %c0_2 = arith.constant 0 : index
    %1 = vector.load %arg2[%c0_1, %c0_2] : memref<1x32xf32, #tpu.memory_space<vmem>>, vector<1x32xf32>
    %2 = vector.broadcast %0 : vector<1024x1xf32> to vector<1024x32xf32>
    %3 = vector.broadcast %1 : vector<1x32xf32> to vector<1024x32xf32>
    %4 = arith.subf %2, %3 : vector<1024x32xf32>
    %c0_3 = arith.constant 0 : index
    %c0_4 = arith.constant 0 : index
    %5 = vector.load %arg3[%c0_3, %c0_4] : memref<1x32xf32, #tpu.memory_space<vmem>>, vector<1x32xf32>
    %6 = vector.broadcast %5 : vector<1x32xf32> to vector<1024x32xf32>
    %7 = arith.mulf %6, %4 : vector<1024x32xf32>
    %8 = arith.mulf %7, %4 : vector<1024x32xf32>
    %9 = math.exp %8 : vector<1024x32xf32>
    %c0_5 = arith.constant 0 : index
    %c0_6 = arith.constant 0 : index
    %10 = vector.load %arg4[%c0_5, %c0_6] : memref<32x128xf32, #tpu.memory_space<vmem>>, vector<32x128xf32>
    %cst = arith.constant dense<0.000000e+00> : vector<1024x128xf32>
    %11 = tpu.matmul %9, %10, %cst {dimension_numbers = #tpu.dot_dimension_numbers<[1], [0], [0], [1], [0, 0, 1, 1], [], []>} : vector<1024x32xf32>, vector<32x128xf32>, vector<1024x128xf32> -> vector<1024x128xf32>
    %c0_7 = arith.constant 0 : index
    %c0_8 = arith.constant 0 : index
    %12 = vector.load %arg5[%c0_7, %c0_8] : memref<1x128xf32, #tpu.memory_space<vmem>>, vector<1x128xf32>
    %13 = vector.broadcast %12 : vector<1x128xf32> to vector<1024x128xf32>
    %14 = arith.addf %11, %13 : vector<1024x128xf32>
    %c0_9 = arith.constant 0 : index
    %c0_10 = arith.constant 0 : index
    %15 = vector.load %arg6[%c0_9, %c0_10] : memref<1024x128xf32, #tpu.memory_space<vmem>>, vector<1024x128xf32>
    tpu.vector_store %arg6[%c0_9, %c0_10], %14 {strides = array<i32>} : memref<1024x128xf32, #tpu.memory_space<vmem>>, vector<1024x128xf32>,
    return
  }
  func.func @transform_0(%arg0: i32) -> (i32, i32) {
    %c0_i32 = arith.constant 0 : i32
    %c0_i32_0 = arith.constant 0 : i32
    return %arg0, %c0_i32 : i32, i32
  }
  func.func @transform_1(%arg0: i32) -> (i32, i32) {
    %c0_i32 = arith.constant 0 : i32
    %c0_i32_0 = arith.constant 0 : i32
    %c0_i32_1 = arith.constant 0 : i32
    return %c0_i32, %c0_i32_0 : i32, i32
  }
  func.func @transform_2(%arg0: i32) -> (i32, i32) {
    %c0_i32 = arith.constant 0 : i32
    %c0_i32_0 = arith.constant 0 : i32
    %c0_i32_1 = arith.constant 0 : i32
    return %c0_i32, %c0_i32_0 : i32, i32
  }
  func.func @transform_3(%arg0: i32) -> (i32, i32) {
    %c0_i32 = arith.constant 0 : i32
    %c0_i32_0 = arith.constant 0 : i32
    %c0_i32_1 = arith.constant 0 : i32
    return %c0_i32, %c0_i32_0 : i32, i32
  }
  func.func @transform_4(%arg0: i32) -> (i32, i32) {
    %c0_i32 = arith.constant 0 : i32
    %c0_i32_0 = arith.constant 0 : i32
    %c0_i32_1 = arith.constant 0 : i32
    return %c0_i32, %c0_i32_0 : i32, i32
  }
  func.func @transform_5(%arg0: i32) -> (i32, i32) {
    %c0_i32 = arith.constant 0 : i32
    %c0_i32_0 = arith.constant 0 : i32
    return %arg0, %c0_i32 : i32, i32
  }
}

</mosaic_0001>

<bundles_post_ra>
// kernel: tpu_custom_call.1
= control target key start
LH: loop header
LB: loop body
LE: loop exit
PB: predicated region body
PF: predicated region fallthrough
CT: control target
= control target key end

     0   :  { %10 = vsyncpa [#allocation3], 0  ;;  %s4406_s0 = inlined_call_operand.vmem [shape: f32[2000,1], index: 0, kind: input, shape index: {}]   ;;  %s4407_s1 = inlined_call_operand.vmem [shape: f32[1,32], index: 1, kind: input, shape index: {}]   ;;  %s4408_s2 = inlined_call_operand.vmem [shape: f32[1,32], index: 2, kind: input, shape index: {}]   ;;  %s4409_s3 = inlined_call_operand.vmem [shape: f32[32,128], index: 3, kind: input, shape index: {}]   ;;  %s4410_s4 = inlined_call_operand.vmem [shape: f32[1,128], index: 4, kind: input, shape index: {}]   ;;  %s4411_s5 = inlined_call_operand.hbm [shape: f32[2000,128], index: 5, kind: output, shape index: {}]  }
   0x1   :  { %12 = vsyncpa [#allocation3 + $0x1], 0  ;;  %s3248_s18 = smov 0   ;;  %s3250_s19 = smov 0  }
   0x2   :  { %s3252_s20 = smov 0   ;;  %s3254_s21 = smov 0  }
   0x3 LB: > { %s3269_s22 = sadd.s32 4294967295, %s3212_s21   ;;  %s2673_s23 = sadd.s32 4294967294, %s3212_s21   ;;  %s3212_s21 = sphi %s3254_s21, %s4418_s21   ;;  %s3208_s20 = sphi %s3252_s20, %s4417_s20   ;;  %s3204_s19 = sphi %s3250_s19, %s4416_s19   ;;  %s3200_s18 = sphi %s3248_s18, %s4415_s18  }
   0x4   : > { %s3273_s24 = sadd.s32 1, %s3212_s21   ;;  %s135_s25 = sadd.s32 1, %s3208_s20 }
   0x5   : > { %s132_s26 = ssub.s32 %s3212_s21, %s3273_s24  ;;  %p145_p0 = scmp.ne.s32.totalorder %s3208_s20, %s3204_s19 }
   0x6   : > { %p133_p1 = scmp.eq.s32.totalorder %s132_s26, 0  ;;  %p146_p2 = scmp.eq.s32.totalorder %s3269_s22, 1 }
   0x7   : > { %p151_p3 = scmp.ne.s32.totalorder %s3204_s19, %s3200_s18  ;;  %p152_p4 = scmp.eq.s32.totalorder %s2673_s23, 1 }
   0x8   : > { %s3284_s27 = scalar_select %p133_p1, %s3208_s20, %s135_s25  }
   0x9   : > { %p3286_p5 = por %p146_p2, %p145_p0  ;;  %p3290_p6 = por %p152_p4, %p151_p3 }
   0xa   : > { %p2676_p7 = scmp.ge.s32.totalorder %s3212_s21, 1  ;;  %p199_p8 = scmp.lt.s32.totalorder %s3212_s21, 3 }
   0xc   : > { %p200_p9 = pnand %p2676_p7, %p199_p8 }
   0xd   : > { %s3297_s30 = sshll.u32 (!%p200_p9), %s3269_s22, 7  ;;  %s228_s8 = sand.u32 (!%p200_p9), 1, %s3204_s19  }
   0xe   : > { %203 = sbr.rel (%p200_p9) target bundleno = 723 (0x2d3), region = 40  ;;  %p236_p10 = scmp.lt.s32.totalorder (!%p200_p9), %s3297_s30, 249 }
   0xf   : > { %s2677_s9 = sshll.u32 (!%p200_p9), %s228_s8, 10  ;;  %s4345_s12 = scalar_lea.sflag (!%p200_p9), [#allocation3], %s228_s8 }
  0x10   : > { %s3631_s13 = scalar_lea.vmem (!%p200_p9), [#allocation2], %s2677_s9 }
  0x13   : > { %v3214_v0 = vmov 0   ;;  %s237_s6 = scalar_select %p236_p10, %s3297_s30, 249  ;;  %v1669_v38 = vld [vmem:[%s4409_s3 + $0x18] sm:$0xff]  ;;  %v1668_v42 = vld [vmem:[%s4409_s3 + $0x10] sm:$0xff]  ;;  %v1667_v43 = vld [vmem:[%s4409_s3 + $0x8] sm:$0xff]  ;;  %vm1674_vm0 = vcmask 261120  }
  0x14   : > { %2873 = vset.pattern.permute.xlu2 %v3214_v0  ;;  %2872 = vset.pattern.permute.xlu1 %v3214_v0  ;;  %v1666_v45 = vld [vmem:[%s4409_s3] sm:$0xff]  ;;  %s2597_s14 = ssub.s32 (%p3286_p5), 250, %s3297_s30 }
  0x15   : > { %2871 = vset.pattern.permute.xlu0 %v3214_v0  ;;  %s2679_s7 = sshll.u32 %s237_s6, 3  ;;  %2071 = vmatpush.msra.mxu0 %v1669_v38  ;;  %v3372_v53 = vld [vmem:[%s4407_s1] ss:$0 sm:$0xff]  ;;  %p2598_p11 = scmp.lt.s32.totalorder (%p3286_p5), %s2597_s14, 128 }
  0x16   : > { %s3304_s10 = scalar_lea.vmem %s4406_s0, %s2679_s7  ;;  %2818 = vmatpush.msra.mxu1 %v1669_v38  ;;  %2819 = vmatpush.msra.mxu2 %v1669_v38  ;;  %v3377_v54 = vld [vmem:[%s4408_s2] ss:$0 sm:$0xff] }
  0x17   : > { %v254_v1 = vld [vmem:[%s3304_s10 + $0x20] sm:$0xff]  ;;  %v252_v2 = vld [vmem:[%s3304_s10 + $0x10] sm:$0xff]  ;;  %v255_v4 = vld [vmem:[%s3304_s10 + $0x28] sm:$0xff]  ;;  %2820 = vmatpush.msra.mxu3 %v1669_v38  ;;  %2072 = vmatpush.msra.mxu0 %v1668_v42 }
  0x18   : > { %v250_v3 = vld [vmem:[%s3304_s10] sm:$0xff]  ;;  %401 = vperm.xlu2 %2873, %v254_v1   ;;  %391 = vperm.xlu1 %2872, %v252_v2   ;;  %v253_v5 = vld [vmem:[%s3304_s10 + $0x18] sm:$0xff]  ;;  %v251_v6 = vld [vmem:[%s3304_s10 + $0x8] sm:$0xff] }
  0x19   : > { %381 = vperm.xlu0 %2871, %v250_v3   ;;  %v258_v7 = vld [vmem:[%s3304_s10 + $0x40] sm:$0xff]  ;;  %v257_v8 = vld [vmem:[%s3304_s10 + $0x38] sm:$0xff]  ;;  %v256_v9 = vld [vmem:[%s3304_s10 + $0x30] sm:$0xff]  ;;  %2821 = vmatpush.msra.mxu1 %v1668_v42 }
  0x1a   : > { %v261_v10 = vld [vmem:[%s3304_s10 + $0x58] sm:$0xff]  ;;  %v260_v11 = vld [vmem:[%s3304_s10 + $0x50] sm:$0xff]  ;;  %v259_v12 = vld [vmem:[%s3304_s10 + $0x48] sm:$0xff]  ;;  %2073 = vmatpush.msra.mxu0 %v1667_v43  ;;  %2822 = vmatpush.msra.mxu2 %v1668_v42 }
  0x1b   : > { %v264_v13 = vld [vmem:[%s3304_s10 + $0x70] sm:$0xff]  ;;  %v263_v14 = vld [vmem:[%s3304_s10 + $0x68] sm:$0xff]  ;;  %v262_v15 = vld [vmem:[%s3304_s10 + $0x60] sm:$0xff]  ;;  %2824 = vmatpush.msra.mxu1 %v1667_v43  ;;  %2823 = vmatpush.msra.mxu3 %v1668_v42 }
  0x1c   : > { %v267_v16 = vld [vmem:[%s3304_s10 + $0x88] sm:$0xff]  ;;  %v266_v17 = vld [vmem:[%s3304_s10 + $0x80] sm:$0xff]  ;;  %v265_v18 = vld [vmem:[%s3304_s10 + $0x78] sm:$0xff]  ;;  %2074 = vmatpush.msra.mxu0 %v1666_v45  ;;  %2825 = vmatpush.msra.mxu2 %v1667_v43 }
  0x1d   : > { %v270_v19 = vld [vmem:[%s3304_s10 + $0xa0] sm:$0xff]  ;;  %v269_v20 = vld [vmem:[%s3304_s10 + $0x98] sm:$0xff]  ;;  %v268_v21 = vld [vmem:[%s3304_s10 + $0x90] sm:$0xff]  ;;  %2827 = vmatpush.msra.mxu1 %v1666_v45  ;;  %2826 = vmatpush.msra.mxu3 %v1667_v43 }
  0x1e   : > { %v273_v22 = vld [vmem:[%s3304_s10 + $0xb8] sm:$0xff]  ;;  %v272_v23 = vld [vmem:[%s3304_s10 + $0xb0] sm:$0xff]  ;;  %v271_v24 = vld [vmem:[%s3304_s10 + $0xa8] sm:$0xff]  ;;  %2828 = vmatpush.msra.mxu2 %v1666_v45 }
  0x1f   : > { %v276_v25 = vld [vmem:[%s3304_s10 + $0xd0] sm:$0xff]  ;;  %v275_v26 = vld [vmem:[%s3304_s10 + $0xc8] sm:$0xff]  ;;  %v274_v27 = vld [vmem:[%s3304_s10 + $0xc0] sm:$0xff]  ;;  %2829 = vmatpush.msra.mxu3 %v1666_v45 }
  0x20   : > { %406 = vperm.xlu2 %2873, %v255_v4   ;;  %396 = vperm.xlu1 %2872, %v253_v5   ;;  %v279_v28 = vld [vmem:[%s3304_s10 + $0xe8] sm:$0xff]  ;;  %v278_v29 = vld [vmem:[%s3304_s10 + $0xe0] sm:$0xff]  ;;  %v277_v30 = vld [vmem:[%s3304_s10 + $0xd8] sm:$0xff] }
  0x21   : > { %386 = vperm.xlu0 %2871, %v251_v6   ;;  %v282_v31 = vld [vmem:[%s3304_s10 + $0x100] sm:$0xff]  ;;  %v281_v32 = vld [vmem:[%s3304_s10 + $0xf8] sm:$0xff]  ;;  %v280_v33 = vld [vmem:[%s3304_s10 + $0xf0] sm:$0xff] }
  0x22   : > { %v285_v34 = vld [vmem:[%s3304_s10 + $0x118] sm:$0xff]  ;;  %v284_v35 = vld [vmem:[%s3304_s10 + $0x110] sm:$0xff]  ;;  %v283_v36 = vld [vmem:[%s3304_s10 + $0x108] sm:$0xff] }
  0x23   : > { %v288_v39 = vld [vmem:[%s3304_s10 + $0x130] sm:$0xff]  ;;  %v287_v40 = vld [vmem:[%s3304_s10 + $0x128] sm:$0xff]  ;;  %v286_v41 = vld [vmem:[%s3304_s10 + $0x120] sm:$0xff] }
  0x24   : > { %v291_v46 = vld [vmem:[%s3304_s10 + $0x148] sm:$0xff]  ;;  %v290_v47 = vld [vmem:[%s3304_s10 + $0x140] sm:$0xff]  ;;  %v289_v48 = vld [vmem:[%s3304_s10 + $0x138] sm:$0xff] }
  0x25   : > { %v294_v50 = vld [vmem:[%s3304_s10 + $0x160] sm:$0xff]  ;;  %v293_v51 = vld [vmem:[%s3304_s10 + $0x158] sm:$0xff]  ;;  %v292_v52 = vld [vmem:[%s3304_s10 + $0x150] sm:$0xff] }
  0x26   : > { %v297_v59 = vld [vmem:[%s3304_s10 + $0x178] sm:$0xff]  ;;  %v296_v60 = vld [vmem:[%s3304_s10 + $0x170] sm:$0xff]  ;;  %v295_v62 = vld [vmem:[%s3304_s10 + $0x168] sm:$0xff] }
  0x27   : > { %v300_v6 = vld [vmem:[%s3304_s10 + $0x190] sm:$0xff]  ;;  %v315_v42 = vld [vmem:[%s3304_s10 + $0x208] sm:$0xff]  ;;  %v346_v43 = vld [vmem:[%s3304_s10 + $0x300] sm:$0xff] }
  0x28   : > { %421 = vperm.xlu2 %2873, %v258_v7   ;;  %416 = vperm.xlu1 %2872, %v257_v8   ;;  %v299_v7 = vld [vmem:[%s3304_s10 + $0x188] sm:$0xff] }
  0x29   : > { %411 = vperm.xlu0 %2871, %v256_v9   ;;  %v298_v9 = vld [vmem:[%s3304_s10 + $0x180] sm:$0xff] }
  0x30   : > { %436 = vperm.xlu2 %2873, %v261_v10   ;;  %431 = vperm.xlu1 %2872, %v260_v11  }
  0x31   : > { %426 = vperm.xlu0 %2871, %v259_v12  }
  0x38   : > { %451 = vperm.xlu2 %2873, %v264_v13   ;;  %446 = vperm.xlu1 %2872, %v263_v14  }
  0x39   : > { %441 = vperm.xlu0 %2871, %v262_v15  }
  0x40   : > { %466 = vperm.xlu2 %2873, %v267_v16   ;;  %461 = vperm.xlu1 %2872, %v266_v17  }
  0x41   : > { %456 = vperm.xlu0 %2871, %v265_v18  }
  0x48   : > { %481 = vperm.xlu2 %2873, %v270_v19   ;;  %476 = vperm.xlu1 %2872, %v269_v20   ;;  %v303_v19 = vld [vmem:[%s3304_s10 + $0x1a8] sm:$0xff]  ;;  %v302_v20 = vld [vmem:[%s3304_s10 + $0x1a0] sm:$0xff] }
  0x49   : > { %471 = vperm.xlu0 %2871, %v268_v21   ;;  %v301_v21 = vld [vmem:[%s3304_s10 + $0x198] sm:$0xff] }
  0x50   : > { %496 = vperm.xlu2 %2873, %v273_v22   ;;  %491 = vperm.xlu1 %2872, %v272_v23  }
  0x51   : > { %486 = vperm.xlu0 %2871, %v271_v24  }
  0x58   : > { %511 = vperm.xlu2 %2873, %v276_v25   ;;  %506 = vperm.xlu1 %2872, %v275_v26  }
  0x59   : > { %501 = vperm.xlu0 %2871, %v274_v27  }
  0x60   : > { %526 = vperm.xlu2 %2873, %v279_v28   ;;  %521 = vperm.xlu1 %2872, %v278_v29  }
  0x61   : > { %516 = vperm.xlu0 %2871, %v277_v30   ;;  %v314_v30 = vld [vmem:[%s3304_s10 + $0x200] sm:$0xff] }
  0x68   : > { %541 = vperm.xlu2 %2873, %v282_v31   ;;  %536 = vperm.xlu1 %2872, %v281_v32   ;;  %v305_v31 = vld [vmem:[%s3304_s10 + $0x1b8] sm:$0xff]  ;;  %v304_v32 = vld [vmem:[%s3304_s10 + $0x1b0] sm:$0xff] }
  0x69   : > { %531 = vperm.xlu0 %2871, %v280_v33  }
  0x70   : > { %556 = vperm.xlu2 %2873, %v285_v34   ;;  %551 = vperm.xlu1 %2872, %v284_v35  }
  0x71   : > { %546 = vperm.xlu0 %2871, %v283_v36  }
  0x72   : > { %v3342_v37 = vpop.permute.xlu2 %401 }
  0x73   : > { %v1026_v28 = vsub.f32 %v3342_v37, %v3372_v53 }
  0x75   : > { %v1158_v33 = vmul.f32 %v3377_v54, %v1026_v28 }
  0x78   : > { %571 = vperm.xlu2 %2873, %v288_v39   ;;  %566 = vperm.xlu1 %2872, %v287_v40   ;;  %v1286_v39 = vmul.f32 %v1158_v33, %v1026_v28  ;;  %v353_v33 = vld [vmem:[%s3304_s10 + $0x338] sm:$0xff] }
  0x79   : > { %561 = vperm.xlu0 %2871, %v286_v41   ;;  %v347_v41 = vld [vmem:[%s3304_s10 + $0x308] sm:$0xff] }
  0x7a   : > { %v3356_v44 = vpop.permute.xlu2 %406  ;;  %v1418_v45 = vmul.f32 1.442695, %v1286_v39 }
  0x7b   : > { %v1027_v40 = vsub.f32 %v3356_v44, %v3372_v53 }
  0x80   : > { %586 = vperm.xlu2 %2873, %v291_v46   ;;  %581 = vperm.xlu1 %2872, %v290_v47   ;;  %v1159_v46 = vmul.f32 %v3377_v54, %v1027_v40 }
  0x81   : > { %576 = vperm.xlu0 %2871, %v289_v48  }
  0x82   : > { %v3364_v49 = vpop.permute.xlu2 %421  ;;  %v1287_v44 = vmul.f32 %v1159_v46, %v1027_v40 }
  0x88   : > { %601 = vperm.xlu2 %2873, %v294_v50   ;;  %596 = vperm.xlu1 %2872, %v293_v51  }
  0x89   : > { %591 = vperm.xlu0 %2871, %v292_v52  }
  0x8a   : > { %v3379_v55 = vpop.permute.xlu2 %436  ;;  %v392_v56 = vpop.permute.xlu1 %391 }
  0x8b   : > { %v382_v57 = vpop.permute.xlu0 %381  ;;  %v1024_v5 = vsub.f32 %v392_v56, %v3372_v53  ;;  %v317_v56 = vld [vmem:[%s3304_s10 + $0x218] sm:$0xff] }
  0x8c   : > { %v1022_v58 = vsub.f32 %v382_v57, %v3372_v53  ;;  %v348_v57 = vld [vmem:[%s3304_s10 + $0x310] sm:$0xff] }
  0x8d   : > { %v1156_v11 = vmul.f32 %v3377_v54, %v1024_v5 }
  0x8e   : > { %v1154_v61 = vmul.f32 %v3377_v54, %v1022_v58 }
  0x8f   : > { %v1284_v17 = vmul.f32 %v1156_v11, %v1024_v5  ;;  %v318_v5 = vld [vmem:[%s3304_s10 + $0x220] sm:$0xff] }
  0x90   : > { %v1282_v63 = vmul.f32 %v1154_v61, %v1022_v58  ;;  %616 = vperm.xlu2 %2873, %v297_v59   ;;  %611 = vperm.xlu1 %2872, %v296_v60   ;;  %v316_v58 = vld [vmem:[%s3304_s10 + $0x210] sm:$0xff]  ;;  %v1420_v59 = vmul.f32 1.442695, %v1287_v44  ;;  %v323_v44 = vld [vmem:[%s3304_s10 + $0x248] sm:$0xff] }
  0x91   : > { %606 = vperm.xlu0 %2871, %v295_v62   ;;  %v1414_v22 = vmul.f32 1.442695, %v1284_v17 }
  0x92   : > { %v1410_v0 = vmul.f32 1.442695, %v1282_v63  ;;  %v3386_v1 = vpop.permute.xlu2 %451  ;;  %v397_v2 = vpop.permute.xlu1 %396 }
  0x93   : > { %v387_v3 = vpop.permute.xlu0 %386  ;;  %v1025_v18 = vsub.f32 %v397_v2, %v3372_v53 }
  0x94   : > { %v1023_v4 = vsub.f32 %v387_v3, %v3372_v53  ;;  %2877 = vpow2.f32 %v1410_v0 }
  0x95   : > { %v1157_v23 = vmul.f32 %v3377_v54, %v1025_v18 }
  0x96   : > { %v1155_v8 = vmul.f32 %v3377_v54, %v1023_v4 }
  0x97   : > { %v1285_v29 = vmul.f32 %v1157_v23, %v1025_v18  ;;  %v320_v18 = vld [vmem:[%s3304_s10 + $0x230] sm:$0xff] }
  0x98   : > { %v1283_v10 = vmul.f32 %v1155_v8, %v1023_v4  ;;  %631 = vperm.xlu2 %2873, %v300_v6   ;;  %626 = vperm.xlu1 %2872, %v299_v7   ;;  %v350_v4 = vld [vmem:[%s3304_s10 + $0x320] sm:$0xff]  ;;  %v349_v6 = vld [vmem:[%s3304_s10 + $0x318] sm:$0xff] }
  0x99   : > { %621 = vperm.xlu0 %2871, %v298_v9   ;;  %v1416_v34 = vmul.f32 1.442695, %v1285_v29 }
  0x9a   : > { %v1412_v12 = vmul.f32 1.442695, %v1283_v10  ;;  %v3395_v13 = vpop.permute.xlu2 %466  ;;  %v3397_v14 = vpop.permute.xlu1 %416 }
  0x9b   : > { %v2878_v15 = vpop.eup %2877  ;;  %v412_v16 = vpop.permute.xlu0 %411  ;;  %v1029_v2 = vsub.f32 %v3397_v14, %v3372_v53 }
  0x9c   : > { %2680 = vmatmul.msk.f32.vlgmr.msra.gmra.mxu0 %vm1674_vm0, %v2878_v15  ;;  %2879 = vpow2.f32 %v1412_v12  ;;  %v1028_v52 = vsub.f32 %v412_v16, %v3372_v53  ;;  %v1030_v15 = vsub.f32 %v3364_v49, %v3372_v53 }
  0x9d   : > { %2881 = vpow2.f32 %v1414_v22  ;;  %v1161_v7 = vmul.f32 %v3377_v54, %v1029_v2 }
  0x9e   : > { %2883 = vpow2.f32 %v1416_v34  ;;  %v1160_v60 = vmul.f32 %v3377_v54, %v1028_v52  ;;  %v1162_v22 = vmul.f32 %v3377_v54, %v1030_v15  ;;  %v321_v34 = vld [vmem:[%s3304_s10 + $0x238] sm:$0xff] }
  0x9f   : > { %2885 = vpow2.f32 %v1418_v45  ;;  %v1289_v16 = vmul.f32 %v1161_v7, %v1029_v2 }
  0xa0   : > { %646 = vperm.xlu2 %2873, %v303_v19   ;;  %641 = vperm.xlu1 %2872, %v302_v20   ;;  %2887 = vpow2.f32 %v1420_v59  ;;  %v1288_v3 = vmul.f32 %v1160_v60, %v1028_v52  ;;  %v351_v19 = vld [vmem:[%s3304_s10 + $0x328] sm:$0xff]  ;;  %v354_v52 = vld [vmem:[%s3304_s10 + $0x340] sm:$0xff] }
  0xa1   : > { %636 = vperm.xlu0 %2871, %v301_v21   ;;  %v319_v20 = vld [vmem:[%s3304_s10 + $0x228] sm:$0xff]  ;;  %v1424_v23 = vmul.f32 1.442695, %v1289_v16 }
  0xa2   : > { %v3405_v24 = vpop.permute.xlu2 %481  ;;  %v3407_v25 = vpop.permute.xlu1 %431  ;;  %v1422_v8 = vmul.f32 1.442695, %v1288_v3 }
  0xa3   : > { %v2880_v26 = vpop.eup %2879  ;;  %v3409_v27 = vpop.permute.xlu0 %426  ;;  %v1032_v46 = vsub.f32 %v3407_v25, %v3372_v53  ;;  %v1033_v25 = vsub.f32 %v3379_v55, %v3372_v53 }
  0xa4   : > { %2681 = vmatmul.msk.f32.gmra.mxu0 %vm1674_vm0, %v2880_v26  ;;  %v2882_v38 = vpop.eup %2881  ;;  %2889 = vpow2.f32 %v1422_v8 }
  0xa5   : > { %v2884_v50 = vpop.eup %2883  ;;  %v1165_v7 = vmul.f32 %v3377_v54, %v1033_v25 }
  0xa6   : > { %v2886_v63 = vpop.eup %2885 }
  0xa7   : > { %v2888_v11 = vpop.eup %2887 }
  0xa8   : > { %701 = vperm.xlu2 %2873, %v314_v30   ;;  %656 = vperm.xlu1 %2872, %v305_v31   ;;  %v1290_v31 = vmul.f32 %v1162_v22, %v1030_v15  ;;  %v1293_v15 = vmul.f32 %v1165_v7, %v1033_v25  ;;  %v325_v22 = vld [vmem:[%s3304_s10 + $0x258] sm:$0xff] }
  0xa9   : > { %651 = vperm.xlu0 %2871, %v304_v32   ;;  %v1031_v32 = vsub.f32 %v3409_v27, %v3372_v53 }
  0xaa   : > { %v3418_v35 = vpop.permute.xlu2 %496  ;;  %v3420_v36 = vpop.permute.xlu1 %446  ;;  %v1426_v40 = vmul.f32 1.442695, %v1290_v31 }
  0xab   : > { %v3422_v37 = vpop.permute.xlu0 %441  ;;  %v2890_v29 = vpop.eup %2889 }
  0xac   : > { %2682 = vmatmul.msk.f32.gmra.mxu0 %vm1674_vm0, %v2882_v38  ;;  %v352_v38 = vld [vmem:[%s3304_s10 + $0x330] sm:$0xff]  ;;  %v1034_v16 = vsub.f32 %v3422_v37, %v3372_v53 }
  0xb0   : > { %866 = vperm.xlu2 %2873, %v347_v41   ;;  %706 = vperm.xlu1 %2872, %v315_v42   ;;  %v1163_v41 = vmul.f32 %v3377_v54, %v1031_v32 }
  0xb1   : > { %861 = vperm.xlu0 %2871, %v346_v43  }
  0xb2   : > { %v3431_v47 = vpop.permute.xlu2 %511  ;;  %v3433_v48 = vpop.permute.xlu1 %461 }
  0xb3   : > { %v3435_v51 = vpop.permute.xlu0 %456 }
  0xb4   : > { %2683 = vmatmul.msk.f32.gmra.mxu0 %vm1674_vm0, %v2884_v50  ;;  %v1291_v50 = vmul.f32 %v1163_v41, %v1031_v32 }
  0xb8   : > { %716 = vperm.xlu2 %2873, %v317_v56   ;;  %871 = vperm.xlu1 %2872, %v348_v57   ;;  %v322_v56 = vld [vmem:[%s3304_s10 + $0x240] sm:$0xff]  ;;  %v1164_v57 = vmul.f32 %v3377_v54, %v1032_v46 }
  0xb9   : > { %711 = vperm.xlu0 %2871, %v316_v58   ;;  %v1428_v58 = vmul.f32 1.442695, %v1291_v50  ;;  %v327_v50 = vld [vmem:[%s3304_s10 + $0x268] sm:$0xff] }
  0xba   : > { %v3443_v61 = vpop.permute.xlu2 %526  ;;  %v3445_v62 = vpop.permute.xlu1 %476  ;;  %v1292_v3 = vmul.f32 %v1164_v57, %v1032_v46  ;;  %v359_v46 = vld [vmem:[%s3304_s10 + $0x368] sm:$0xff] }
  0xbb   : > { %v3447_v0 = vpop.permute.xlu0 %471 }
  0xbc   : > { %2684 = vmatmul.msk.f32.gmra.mxu0 %vm1674_vm0, %v2886_v63  ;;  %v1430_v8 = vmul.f32 1.442695, %v1292_v3 }
  0xc0   : > { %881 = vperm.xlu2 %2873, %v350_v4   ;;  %721 = vperm.xlu1 %2872, %v318_v5   ;;  %v356_v4 = vld [vmem:[%s3304_s10 + $0x350] sm:$0xff] }
  0xc1   : > { %876 = vperm.xlu0 %2871, %v349_v6   ;;  %v324_v5 = vld [vmem:[%s3304_s10 + $0x250] sm:$0xff]  ;;  %v355_v6 = vld [vmem:[%s3304_s10 + $0x348] sm:$0xff] }
  0xc2   : > { %v542_v9 = vpop.permute.xlu2 %541  ;;  %v3456_v10 = vpop.permute.xlu1 %491 }
  0xc3   : > { %v1054_v12 = vsub.f32 %v542_v9, %v3372_v53  ;;  %v3459_v14 = vpop.permute.xlu0 %486 }
  0xc4   : > { %2685 = vmatmul.msk.f32.gmra.mxu0 %vm1674_vm0, %v2888_v11 }
  0xc5   : > { %v1186_v17 = vmul.f32 %v3377_v54, %v1054_v12 }
  0xc7   : > { %v1314_v21 = vmul.f32 %v1186_v17, %v1054_v12 }
  0xc8   : > { %731 = vperm.xlu2 %2873, %v320_v18   ;;  %886 = vperm.xlu1 %2872, %v351_v19   ;;  %v326_v19 = vld [vmem:[%s3304_s10 + $0x260] sm:$0xff] }
  0xc9   : > { %v1474_v26 = vmul.f32 1.442695, %v1314_v21  ;;  %726 = vperm.xlu0 %2871, %v319_v20   ;;  %v357_v20 = vld [vmem:[%s3304_s10 + $0x358] sm:$0xff] }
  0xca   : > { %v3469_v28 = vpop.permute.xlu2 %556  ;;  %v3471_v49 = vpop.permute.xlu1 %506 }
  0xcb   : > { %2891 = vpow2.f32 %v1474_v26  ;;  %v3473_v30 = vpop.permute.xlu0 %501  ;;  %v1166_v26 = vmul.f32 %v3377_v54, %v1034_v16  ;;  %v1057_v41 = vsub.f32 %v3469_v28, %v3372_v53 }
  0xcc   : > { %2686 = vmatmul.msk.f32.gmra.mxu0 %vm1674_vm0, %v2890_v29  ;;  %2893 = vpow2.f32 %v1424_v23  ;;  %v1432_v23 = vmul.f32 1.442695, %v1293_v15 }
  0xcd   : > { %2895 = vpow2.f32 %v1426_v40  ;;  %v1294_v40 = vmul.f32 %v1166_v26, %v1034_v16  ;;  %v1189_v57 = vmul.f32 %v3377_v54, %v1057_v41 }
  0xce   : > { %2897 = vpow2.f32 %v1428_v58 }
  0xcf   : > { %2899 = vpow2.f32 %v1430_v8  ;;  %v329_v8 = vld [vmem:[%s3304_s10 + $0x278] sm:$0xff] }
  0xd0   : > { %896 = vperm.xlu2 %2873, %v353_v33   ;;  %736 = vperm.xlu1 %2872, %v321_v34   ;;  %2901 = vpow2.f32 %v1432_v23  ;;  %v1037_v23 = vsub.f32 %v3435_v51, %v3372_v53 }
  0xd1   : > { %v2892_v39 = vpop.eup %2891  ;;  %891 = vperm.xlu0 %2871, %v352_v38  }
  0xd2   : > { %2712 = vmatmul.msk.f32.vlgmr.msra.gmra.mxu1 %vm1674_vm0, %v2892_v39  ;;  %v3483_v42 = vpop.permute.xlu2 %571  ;;  %v3485_v43 = vpop.permute.xlu1 %521  ;;  %v1035_v39 = vsub.f32 %v3420_v36, %v3372_v53 }
  0xd3   : > { %v2894_v27 = vpop.eup %2893  ;;  %v3487_v45 = vpop.permute.xlu0 %516 }
  0xd4   : > { %2687 = vmatmul.msk.f32.gmra.mxu0 %vm1674_vm0, %v2894_v27  ;;  %v2896_v63 = vpop.eup %2895 }
  0xd5   : > { %v2898_v55 = vpop.eup %2897 }
  0xd6   : > { %v2900_v34 = vpop.eup %2899 }
  0xd7   : > { %v2902_v58 = vpop.eup %2901 }
  0xd8   : > { %746 = vperm.xlu2 %2873, %v323_v44   ;;  %901 = vperm.xlu1 %2872, %v354_v52   ;;  %v358_v44 = vld [vmem:[%s3304_s10 + $0x360] sm:$0xff]  ;;  %v1167_v52 = vmul.f32 %v3377_v54, %v1035_v39 }
  0xd9   : > { %741 = vperm.xlu0 %2871, %v322_v56   ;;  %v1434_v56 = vmul.f32 1.442695, %v1294_v40 }
  0xda   : > { %v3496_v59 = vpop.permute.xlu2 %586  ;;  %v3498_v60 = vpop.permute.xlu1 %536 }
  0xdb   : > { %v3500_v2 = vpop.permute.xlu0 %531 }
  0xdc   : > { %2688 = vmatmul.msk.f32.gmra.mxu0 %vm1674_vm0, %v2896_v63 }
  0xe0   : > { %911 = vperm.xlu2 %2873, %v356_v4   ;;  %751 = vperm.xlu1 %2872, %v324_v5   ;;  %v1036_v4 = vsub.f32 %v3386_v1, %v3372_v53  ;;  %v1295_v5 = vmul.f32 %v1167_v52, %v1035_v39  ;;  %v1169_v39 = vmul.f32 %v3377_v54, %v1037_v23 }
  0xe1   : > { %906 = vperm.xlu0 %2871, %v355_v6   ;;  %v1317_v6 = vmul.f32 %v1189_v57, %v1057_v41  ;;  %v1038_v52 = vsub.f32 %v3433_v48, %v3372_v53  ;;  %v1060_v57 = vsub.f32 %v3483_v42, %v3372_v53 }
  0xe2   : > { %v3509_v9 = vpop.permute.xlu2 %601  ;;  %v552_v11 = vpop.permute.xlu1 %551  ;;  %v1436_v15 = vmul.f32 1.442695, %v1295_v5  ;;  %v331_v5 = vld [vmem:[%s3304_s10 + $0x288] sm:$0xff] }
  0xe3   : > { %v547_v12 = vpop.permute.xlu0 %546  ;;  %v1056_v18 = vsub.f32 %v552_v11, %v3372_v53  ;;  %v360_v11 = vld [vmem:[%s3304_s10 + $0x370] sm:$0xff]  ;;  %v1480_v16 = vmul.f32 1.442695, %v1317_v6  ;;  %v1192_v48 = vmul.f32 %v3377_v54, %v1060_v57 }
  0xe4   : > { %2689 = vmatmul.msk.f32.gmra.mxu0 %vm1674_vm0, %v2898_v55  ;;  %v1055_v17 = vsub.f32 %v547_v12, %v3372_v53  ;;  %v328_v55 = vld [vmem:[%s3304_s10 + $0x270] sm:$0xff]  ;;  %v1168_v12 = vmul.f32 %v3377_v54, %v1036_v4 }
  0xe5   : > { %v1188_v37 = vmul.f32 %v3377_v54, %v1056_v18 }
  0xe6   : > { %v1187_v21 = vmul.f32 %v3377_v54, %v1055_v17 }
  0xe7   : > { %v1316_v27 = vmul.f32 %v1188_v37, %v1056_v18  ;;  %v362_v37 = vld [vmem:[%s3304_s10 + $0x380] sm:$0xff] }
  0xe8   : > { %v1315_v29 = vmul.f32 %v1187_v21, %v1055_v17  ;;  %761 = vperm.xlu2 %2873, %v326_v19   ;;  %916 = vperm.xlu1 %2872, %v357_v20  }
  0xe9   : > { %756 = vperm.xlu0 %2871, %v325_v22   ;;  %v1478_v36 = vmul.f32 1.442695, %v1316_v27  ;;  %v1296_v22 = vmul.f32 %v1168_v12, %v1036_v4  ;;  %v363_v4 = vld [vmem:[%s3304_s10 + $0x388] sm:$0xff] }
  0xea   : > { %v1476_v31 = vmul.f32 1.442695, %v1315_v29  ;;  %v3522_v32 = vpop.permute.xlu2 %616  ;;  %v567_v33 = vpop.permute.xlu1 %566 }
  0xeb   : > { %v562_v38 = vpop.permute.xlu0 %561  ;;  %v1059_v26 = vsub.f32 %v567_v33, %v3372_v53 }
  0xec   : > { %2690 = vmatmul.msk.f32.gmra.mxu0 %vm1674_vm0, %v2900_v34  ;;  %2903 = vpow2.f32 %v1476_v31  ;;  %v1058_v7 = vsub.f32 %v562_v38, %v3372_v53  ;;  %v330_v31 = vld [vmem:[%s3304_s10 + $0x280] sm:$0xff]  ;;  %v361_v34 = vld [vmem:[%s3304_s10 + $0x378] sm:$0xff]  ;;  %v1438_v38 = vmul.f32 1.442695, %v1296_v22 }
  0xed   : > { %2905 = vpow2.f32 %v1434_v56  ;;  %v1191_v40 = vmul.f32 %v3377_v54, %v1059_v26  ;;  %v1297_v56 = vmul.f32 %v1169_v39, %v1037_v23  ;;  %v365_v23 = vld [vmem:[%s3304_s10 + $0x398] sm:$0xff] }
  0xee   : > { %2907 = vpow2.f32 %v1478_v36  ;;  %v1190_v1 = vmul.f32 %v3377_v54, %v1058_v7 }
  0xef   : > { %2909 = vpow2.f32 %v1436_v15  ;;  %v1319_v36 = vmul.f32 %v1191_v40, %v1059_v26  ;;  %v333_v26 = vld [vmem:[%s3304_s10 + $0x298] sm:$0xff] }
  0xf0   : > { %926 = vperm.xlu2 %2873, %v359_v46   ;;  %766 = vperm.xlu1 %2872, %v327_v50   ;;  %2911 = vpow2.f32 %v1480_v16  ;;  %v1318_v29 = vmul.f32 %v1190_v1, %v1058_v7  ;;  %v1170_v7 = vmul.f32 %v3377_v54, %v1038_v52  ;;  %v1039_v1 = vsub.f32 %v3395_v13, %v3372_v53 }
  0xf1   : > { %921 = vperm.xlu0 %2871, %v358_v44   ;;  %2913 = vpow2.f32 %v1438_v38 }
  0xf2   : > { %v3534_v63 = vpop.permute.xlu2 %631  ;;  %v3536_v28 = vpop.permute.xlu1 %581  ;;  %v1482_v41 = vmul.f32 1.442695, %v1318_v29  ;;  %v364_v29 = vld [vmem:[%s3304_s10 + $0x390] sm:$0xff] }
  0xf3   : > { %v2904_v25 = vpop.eup %2903  ;;  %v3538_v3 = vpop.permute.xlu0 %576 }
  0xf4   : > { %2691 = vmatmul.msk.f32.gmra.mxu0 %vm1674_vm0, %v2902_v58  ;;  %2713 = vmatmul.msk.f32.gmra.mxu1 %vm1674_vm0, %v2904_v25  ;;  %v2906_v17 = vpop.eup %2905  ;;  %2915 = vpow2.f32 %v1482_v41  ;;  %v332_v25 = vld [vmem:[%s3304_s10 + $0x290] sm:$0xff]  ;;  %v1061_v22 = vsub.f32 %v3538_v3, %v3372_v53 }
  0xf5   : > { %v2908_v20 = vpop.eup %2907 }
  0xf6   : > { %v2910_v51 = vpop.eup %2909  ;;  %v1193_v38 = vmul.f32 %v3377_v54, %v1061_v22 }
  0xf7   : > { %v2912_v33 = vpop.eup %2911 }
  0xf8   : > { %776 = vperm.xlu2 %2873, %v329_v8   ;;  %931 = vperm.xlu1 %2872, %v360_v11   ;;  %v1440_v8 = vmul.f32 1.442695, %v1297_v56  ;;  %v1484_v11 = vmul.f32 1.442695, %v1319_v36  ;;  %v2914_v42 = vpop.eup %2913  ;;  %v366_v56 = vld [vmem:[%s3304_s10 + $0x3a0] sm:$0xff] }
  0xf9   : > { %771 = vperm.xlu0 %2871, %v328_v55   ;;  %v334_v36 = vld [vmem:[%s3304_s10 + $0x2a0] sm:$0xff] }
  0xfa   : > { %v3550_v18 = vpop.permute.xlu2 %646  ;;  %v3552_v19 = vpop.permute.xlu1 %596 }
  0xfb   : > { %v3554_v21 = vpop.permute.xlu0 %591  ;;  %v2916_v15 = vpop.eup %2915 }
  0xfc   : > { %2692 = vmatmul.msk.f32.gmra.mxu0 %vm1674_vm0, %v2906_v17  ;;  %2714 = vmatmul.msk.f32.gmra.mxu1 %vm1674_vm0, %v2908_v20  ;;  %v1298_v17 = vmul.f32 %v1170_v7, %v1038_v52  ;;  %v1320_v20 = vmul.f32 %v1192_v48, %v1060_v57  ;;  %v335_v52 = vld [vmem:[%s3304_s10 + $0x2a8] sm:$0xff]  ;;  %v3617_v57 = vld [vmem:[%s4410_s4] ss:$0 sm:$0xff] }
 0x100   : > { %941 = vperm.xlu2 %2873, %v362_v37   ;;  %781 = vperm.xlu1 %2872, %v330_v31   ;;  %v1171_v37 = vmul.f32 %v3377_v54, %v1039_v1  ;;  %v1442_v31 = vmul.f32 1.442695, %v1298_v17 }
 0x101   : > { %936 = vperm.xlu0 %2871, %v361_v34   ;;  %v1486_v34 = vmul.f32 1.442695, %v1320_v20  ;;  %v367_v20 = vld [vmem:[%s3304_s10 + $0x3a8] sm:$0xff] }
 0x102   : > { %v702_v27 = vpop.permute.xlu2 %701  ;;  %v3566_v46 = vpop.permute.xlu1 %611 }
 0x103   : > { %v1086_v50 = vsub.f32 %v702_v27, %v3372_v53  ;;  %v3569_v44 = vpop.permute.xlu0 %606  ;;  %v1040_v27 = vsub.f32 %v3447_v0, %v3372_v53 }
 0x104   : > { %2693 = vmatmul.msk.f32.gmra.mxu0 %vm1674_vm0, %v2910_v51  ;;  %2715 = vmatmul.msk.f32.gmra.mxu1 %vm1674_vm0, %v2912_v33  ;;  %v1299_v51 = vmul.f32 %v1171_v37, %v1039_v1  ;;  %v1062_v33 = vsub.f32 %v3536_v28, %v3372_v53  ;;  %v336_v1 = vld [vmem:[%s3304_s10 + $0x2b0] sm:$0xff] }
 0x105   : > { %v1218_v58 = vmul.f32 %v3377_v54, %v1086_v50 }
 0x106   : > { %v1444_v0 = vmul.f32 1.442695, %v1299_v51 }
 0x107   : > { %v1346_v6 = vmul.f32 %v1218_v58, %v1086_v50  ;;  %v1321_v50 = vmul.f32 %v1193_v38, %v1061_v22  ;;  %v1172_v58 = vmul.f32 %v3377_v54, %v1040_v27 }
 0x108   : > { %791 = vperm.xlu2 %2873, %v332_v25   ;;  %946 = vperm.xlu1 %2872, %v363_v4   ;;  %v1194_v25 = vmul.f32 %v3377_v54, %v1062_v33 }
 0x109   : > { %v1538_v55 = vmul.f32 1.442695, %v1346_v6  ;;  %786 = vperm.xlu0 %2871, %v331_v5   ;;  %v1488_v4 = vmul.f32 1.442695, %v1321_v50  ;;  %v1041_v6 = vsub.f32 %v3445_v62, %v3372_v53 }
 0x10a   : > { %v3583_v12 = vpop.permute.xlu1 %626  ;;  %v1322_v62 = vmul.f32 %v1194_v25, %v1062_v33  ;;  %v1064_v33 = vsub.f32 %v3554_v21, %v3372_v53  ;;  %v337_v25 = vld [vmem:[%s3304_s10 + $0x2b8] sm:$0xff] }
 0x10b   : > { %2917 = vpow2.f32 %v1538_v55  ;;  %v3585_v16 = vpop.permute.xlu0 %621  ;;  %v1173_v17 = vmul.f32 %v3377_v54, %v1041_v6 }
 0x10c   : > { %2919 = vpow2.f32 %v1440_v8  ;;  %2694 = vmatmul.msk.f32.gmra.mxu0 %vm1674_vm0, %v2914_v42  ;;  %2716 = vmatmul.msk.f32.gmra.mxu1 %vm1674_vm0, %v2916_v15  ;;  %v1300_v42 = vmul.f32 %v1172_v58, %v1040_v27  ;;  %v368_v15 = vld [vmem:[%s3304_s10 + $0x3b0] sm:$0xff] }
 0x10d   : > { %2921 = vpow2.f32 %v1484_v11  ;;  %v1063_v11 = vsub.f32 %v3496_v59, %v3372_v53 }
 0x10e   : > { %2923 = vpow2.f32 %v1442_v31  ;;  %v1446_v22 = vmul.f32 1.442695, %v1300_v42  ;;  %v1301_v31 = vmul.f32 %v1173_v17, %v1041_v6 }
 0x10f   : > { %2925 = vpow2.f32 %v1486_v34  ;;  %v1195_v59 = vmul.f32 %v3377_v54, %v1063_v11 }
 0x110   : > { %956 = vperm.xlu2 %2873, %v365_v23   ;;  %796 = vperm.xlu1 %2872, %v333_v26   ;;  %2927 = vpow2.f32 %v1444_v0  ;;  %v867_v23 = vpop.permute.xlu2 %866  ;;  %v1490_v26 = vmul.f32 1.442695, %v1322_v62 }
 0x111   : > { %v2918_v13 = vpop.eup %2917  ;;  %951 = vperm.xlu0 %2871, %v364_v29   ;;  %2929 = vpow2.f32 %v1488_v4  ;;  %v1119_v0 = vsub.f32 %v867_v23, %v3372_v53  ;;  %v1065_v23 = vsub.f32 %v3552_v19, %v3372_v53 }
 0x112   : > { %v2920_v39 = vpop.eup %2919  ;;  %2744 = vmatmul.msk.f32.vlgmr.msra.gmra.mxu2 %vm1674_vm0, %v2918_v13  ;;  %v3599_v3 = vpop.permute.xlu1 %641  ;;  %2931 = vpow2.f32 %v1446_v22  ;;  %v1043_v22 = vsub.f32 %v3459_v14, %v3372_v53  ;;  %v306_v14 = vld [vmem:[%s3304_s10 + $0x1c0] sm:$0xff] }
 0x113   : > { %v2922_v40 = vpop.eup %2921  ;;  %v3601_v41 = vpop.permute.xlu0 %636  ;;  %2933 = vpow2.f32 %v1490_v26  ;;  %v1251_v42 = vmul.f32 %v3377_v54, %v1119_v0 }
 0x114   : > { %2695 = vmatmul.msk.f32.gmra.mxu0 %vm1674_vm0, %v2920_v39  ;;  %2717 = vmatmul.msk.f32.gmra.mxu1 %vm1674_vm0, %v2922_v40  ;;  %v2924_v5 = vpop.eup %2923  ;;  %v1042_v39 = vsub.f32 %v3405_v24, %v3372_v53  ;;  %v1323_v40 = vmul.f32 %v1195_v59, %v1063_v11  ;;  %v338_v24 = vld [vmem:[%s3304_s10 + $0x2c0] sm:$0xff] }
 0x115   : > { %v2926_v48 = vpop.eup %2925 }
 0x116   : > { %v2928_v37 = vpop.eup %2927  ;;  %v1174_v21 = vmul.f32 %v3377_v54, %v1042_v39  ;;  %v1492_v4 = vmul.f32 1.442695, %v1323_v40 }
 0x117   : > { %v2930_v38 = vpop.eup %2929 }
 0x118   : > { %806 = vperm.xlu2 %2873, %v335_v52   ;;  %961 = vperm.xlu1 %2872, %v366_v56   ;;  %v369_v56 = vld [vmem:[%s3304_s10 + $0x3b8] sm:$0xff]  ;;  %v2932_v11 = vpop.eup %2931  ;;  %v717_v62 = vpop.permute.xlu2 %716  ;;  %v1302_v59 = vmul.f32 %v1174_v21, %v1042_v39  ;;  %v370_v39 = vld [vmem:[%s3304_s10 + $0x3c0] sm:$0xff] }
 0x119   : > { %v2076_v28 = vpop.f32.mrf.mxu0  ;;  %801 = vperm.xlu0 %2871, %v334_v36   ;;  %v1448_v36 = vmul.f32 1.442695, %v1301_v31  ;;  %v1089_v31 = vsub.f32 %v717_v62, %v3372_v53 }
 0x11a   : > { %v2077_v7 = vadd.f32 %v3617_v57, %v2076_v28  ;;  %v3625_v8 = vpop.permute.xlu1 %656  ;;  %v1450_v40 = vmul.f32 1.442695, %v1302_v59 }
 0x11b   : > { %v3629_v55 = vpop.permute.xlu0 %651  ;;  %2935 = vpow2.f32 %v1448_v36 }
 0x11c   : > { %2460 = vst [vmem:[%s3631_s13] sm:$0xff] %v2077_v7  ;;  %2696 = vmatmul.msk.f32.gmra.mxu0 %vm1674_vm0, %v2924_v5  ;;  %2718 = vmatmul.msk.f32.gmra.mxu1 %vm1674_vm0, %v2926_v48  ;;  %v1196_v5 = vmul.f32 %v3377_v54, %v1064_v33  ;;  %2937 = vpow2.f32 %v1492_v4 }
 0x120   : > { %971 = vperm.xlu2 %2873, %v368_v15   ;;  %811 = vperm.xlu1 %2872, %v336_v1  }
 0x121   : > { %v2079_v29 = vpop.f32.mrf.mxu0  ;;  %966 = vperm.xlu0 %2871, %v367_v20   ;;  %v2934_v20 = vpop.eup %2933 }
 0x122   : > { %v2080_v13 = vadd.f32 %v3617_v57, %v2079_v29  ;;  %v707_v34 = vpop.permute.xlu1 %706  ;;  %v1324_v29 = vmul.f32 %v1196_v5, %v1064_v33  ;;  %v1197_v33 = vmul.f32 %v3377_v54, %v1065_v23 }
 0x123   : > { %v1087_v51 = vsub.f32 %v707_v34, %v3372_v53  ;;  %v862_v27 = vpop.permute.xlu0 %861  ;;  %v1379_v34 = vmul.f32 %v1251_v42, %v1119_v0 }
 0x124   : > { %2461 = vst [vmem:[%s3631_s13 + $0x8] sm:$0xff] %v2080_v13  ;;  %2697 = vmatmul.msk.f32.gmra.mxu0 %vm1674_vm0, %v2928_v37  ;;  %2719 = vmatmul.msk.f32.gmra.mxu1 %vm1674_vm0, %v2930_v38  ;;  %v1118_v50 = vsub.f32 %v862_v27, %v3372_v53  ;;  %v339_v13 = vld [vmem:[%s3304_s10 + $0x2c8] sm:$0xff]  ;;  %v2936_v27 = vpop.eup %2935  ;;  %v1325_v42 = vmul.f32 %v1197_v33, %v1065_v23 }
 0x125   : > { %v1219_v52 = vmul.f32 %v3377_v54, %v1087_v51 }
 0x126   : > { %v1250_v58 = vmul.f32 %v3377_v54, %v1118_v50 }
 0x127   : > { %v1347_v28 = vmul.f32 %v1219_v52, %v1087_v51  ;;  %v1175_v51 = vmul.f32 %v3377_v54, %v1043_v22 }
 0x128   : > { %v1378_v6 = vmul.f32 %v1250_v58, %v1118_v50  ;;  %821 = vperm.xlu2 %2873, %v338_v24   ;;  %976 = vperm.xlu1 %2872, %v369_v56   ;;  %v1494_v50 = vmul.f32 1.442695, %v1324_v29  ;;  %v2938_v24 = vpop.eup %2937  ;;  %v1221_v56 = vmul.f32 %v3377_v54, %v1089_v31  ;;  %v1604_v58 = vmul.f32 1.442695, %v1379_v34  ;;  %v882_v29 = vpop.permute.xlu2 %881 }
 0x129   : > { %v1540_v7 = vmul.f32 1.442695, %v1347_v28  ;;  %v2082_v48 = vpop.f32.mrf.mxu0  ;;  %816 = vperm.xlu0 %2871, %v337_v25  }
 0x12a   : > { %v1602_v15 = vmul.f32 1.442695, %v1378_v6  ;;  %v2083_v1 = vadd.f32 %v3617_v57, %v2082_v48  ;;  %v872_v17 = vpop.permute.xlu1 %871  ;;  %v1044_v6 = vsub.f32 %v3456_v10, %v3372_v53  ;;  %v1349_v62 = vmul.f32 %v1221_v56, %v1089_v31  ;;  %v340_v10 = vld [vmem:[%s3304_s10 + $0x2d0] sm:$0xff] }
 0x12b   : > { %v712_v26 = vpop.permute.xlu0 %711  ;;  %2939 = vpow2.f32 %v1540_v7  ;;  %v1120_v38 = vsub.f32 %v872_v17, %v3372_v53  ;;  %v1303_v7 = vmul.f32 %v1175_v51, %v1043_v22  ;;  %v1067_v56 = vsub.f32 %v3569_v44, %v3372_v53  ;;  %v3714_v44 = vld [vmem:[%s4407_s1] ss:$0 sm:$0xff] }
 0x12c   : > { %2462 = vst [vmem:[%s3631_s13 + $0x10] sm:$0xff] %v2083_v1  ;;  %2698 = vmatmul.msk.f32.gmra.mxu0 %vm1674_vm0, %v2932_v11  ;;  %2720 = vmatmul.msk.f32.gmra.mxu1 %vm1674_vm0, %v2934_v20  ;;  %v1088_v37 = vsub.f32 %v712_v26, %v3372_v53  ;;  %2941 = vpow2.f32 %v1602_v15  ;;  %v1066_v11 = vsub.f32 %v3509_v9, %v3372_v53  ;;  %v307_v1 = vld [vmem:[%s3304_s10 + $0x1c8] sm:$0xff]  ;;  %v1496_v26 = vmul.f32 1.442695, %v1325_v42 }
 0x12d   : > { %v1252_v25 = vmul.f32 %v3377_v54, %v1120_v38  ;;  %2943 = vpow2.f32 %v1450_v40  ;;  %v371_v9 = vld [vmem:[%s3304_s10 + $0x3c8] sm:$0xff]  ;;  %v1176_v59 = vmul.f32 %v3377_v54, %v1044_v6  ;;  %v1452_v22 = vmul.f32 1.442695, %v1303_v7 }
 0x12e   : > { %v1220_v19 = vmul.f32 %v3377_v54, %v1088_v37  ;;  %2945 = vpow2.f32 %v1494_v50  ;;  %v1198_v23 = vmul.f32 %v3377_v54, %v1066_v11  ;;  %v1544_v31 = vmul.f32 1.442695, %v1349_v62 }
 0x12f   : > { %v1380_v17 = vmul.f32 %v1252_v25, %v1120_v38  ;;  %v1304_v33 = vmul.f32 %v1176_v59, %v1044_v6 }
 0x130   : > { %v1348_v52 = vmul.f32 %v1220_v19, %v1088_v37  ;;  %826 = vperm.xlu2 %2873, %v339_v13   ;;  %661 = vperm.xlu1 %2872, %v306_v14  }
 0x131   : > { %v2085_v36 = vpop.f32.mrf.mxu0  ;;  %981 = vperm.xlu0 %2871, %v370_v39   ;;  %v2940_v0 = vpop.eup %2939  ;;  %v1606_v38 = vmul.f32 1.442695, %v1380_v17 }
 0x132   : > { %v1542_v21 = vmul.f32 1.442695, %v1348_v52  ;;  %v2086_v4 = vadd.f32 %v3617_v57, %v2085_v36  ;;  %v722_v28 = vpop.permute.xlu1 %721  ;;  %v2942_v5 = vpop.eup %2941  ;;  %2745 = vmatmul.msk.f32.gmra.mxu2 %vm1674_vm0, %v2940_v0  ;;  %v341_v36 = vld [vmem:[%s3304_s10 + $0x2d8] sm:$0xff]  ;;  %v308_v0 = vld [vmem:[%s3304_s10 + $0x1d0] sm:$0xff] }
 0x133   : > { %v877_v48 = vpop.permute.xlu0 %876  ;;  %v1090_v15 = vsub.f32 %v722_v28, %v3372_v53  ;;  %2776 = vmatmul.msk.f32.vlgmr.msra.gmra.mxu3 %vm1674_vm0, %v2942_v5  ;;  %v2944_v37 = vpop.eup %2943  ;;  %v1454_v28 = vmul.f32 1.442695, %v1304_v33 }
 0x134   : > { %2463 = vst [vmem:[%s3631_s13 + $0x18] sm:$0xff] %v2086_v4  ;;  %2699 = vmatmul.msk.f32.gmra.mxu0 %vm1674_vm0, %v2936_v27  ;;  %2721 = vmatmul.msk.f32.gmra.mxu1 %vm1674_vm0, %v2938_v24  ;;  %2947 = vpow2.f32 %v1542_v21  ;;  %v1121_v20 = vsub.f32 %v877_v48, %v3372_v53  ;;  %v2946_v34 = vpop.eup %2945  ;;  %v1045_v27 = vsub.f32 %v3418_v35, %v3372_v53  ;;  %v372_v21 = vld [vmem:[%s3304_s10 + $0x3d0] sm:$0xff] }
 0x135   : > { %2949 = vpow2.f32 %v1604_v58  ;;  %v1222_v13 = vmul.f32 %v3377_v54, %v1090_v15  ;;  %v1326_v24 = vmul.f32 %v1198_v23, %v1066_v11 }
 0x136   : > { %v1253_v19 = vmul.f32 %v3377_v54, %v1121_v20  ;;  %2951 = vpow2.f32 %v1452_v22  ;;  %v1122_v54 = vsub.f32 %v882_v29, %v3372_v53  ;;  %v3721_v53 = vld [vmem:[%s4408_s2] ss:$0 sm:$0xff]  ;;  %v1046_v22 = vsub.f32 %v3473_v30, %v3714_v44 }
 0x137   : > { %2953 = vpow2.f32 %v1496_v26  ;;  %v1350_v35 = vmul.f32 %v1222_v13, %v1090_v15  ;;  %v1177_v4 = vmul.f32 %v3721_v53, %v1045_v27  ;;  %v1498_v5 = vmul.f32 1.442695, %v1326_v24  ;;  %v732_v15 = vpop.permute.xlu2 %731  ;;  %v342_v30 = vld [vmem:[%s3304_s10 + $0x2e0] sm:$0xff]  ;;  %v309_v13 = vld [vmem:[%s3304_s10 + $0x1d8] sm:$0xff] }
 0x138   : > { %831 = vperm.xlu2 %2873, %v340_v10   ;;  %666 = vperm.xlu1 %2872, %v307_v1   ;;  %2955 = vpow2.f32 %v1544_v31  ;;  %v1381_v58 = vmul.f32 %v1253_v19, %v1121_v20  ;;  %v1199_v6 = vmul.f32 %v3721_v53, %v1067_v56  ;;  %v1254_v48 = vmul.f32 %v3721_v53, %v1122_v54 }
 0x139   : > { %v2088_v14 = vpop.f32.mrf.mxu0  ;;  %986 = vperm.xlu0 %2871, %v371_v9   ;;  %2957 = vpow2.f32 %v1606_v38  ;;  %v1546_v11 = vmul.f32 1.442695, %v1350_v35  ;;  %v1305_v59 = vmul.f32 %v1177_v4, %v1045_v27  ;;  %v1068_v26 = vsub.f32 %v3566_v46, %v3714_v44 }
 0x13a   : > { %v2089_v39 = vadd.f32 %v3617_v57, %v2088_v14  ;;  %v887_v40 = vpop.permute.xlu1 %886  ;;  %v2948_v51 = vpop.eup %2947  ;;  %v1608_v10 = vmul.f32 1.442695, %v1381_v58  ;;  %2959 = vpow2.f32 %v1454_v28  ;;  %v1327_v29 = vmul.f32 %v1199_v6, %v1067_v56 }
 0x13b   : > { %v727_v50 = vpop.permute.xlu0 %726  ;;  %v2950_v52 = vpop.eup %2949  ;;  %2746 = vmatmul.msk.f32.gmra.mxu2 %vm1674_vm0, %v2948_v51  ;;  %2961 = vpow2.f32 %v1498_v5  ;;  %v1092_v31 = vsub.f32 %v732_v15, %v3714_v44  ;;  %v1123_v14 = vsub.f32 %v887_v40, %v3714_v44  ;;  %v1456_v38 = vmul.f32 1.442695, %v1305_v59 }
 0x13c   : > { %2464 = vst [vmem:[%s3631_s13 + $0x20] sm:$0xff] %v2089_v39  ;;  %2700 = vmatmul.msk.f32.gmra.mxu0 %vm1674_vm0, %v2944_v37  ;;  %2722 = vmatmul.msk.f32.gmra.mxu1 %vm1674_vm0, %v2946_v34  ;;  %v1091_v25 = vsub.f32 %v727_v50, %v3714_v44  ;;  %v2952_v7 = vpop.eup %2951  ;;  %v1382_v37 = vmul.f32 %v1254_v48, %v1122_v54  ;;  %2963 = vpow2.f32 %v1546_v11  ;;  %v373_v34 = vld [vmem:[%s3304_s10 + $0x3d8] sm:$0xff]  ;;  %v1500_v51 = vmul.f32 1.442695, %v1327_v29  ;;  %v374_v11 = vld [vmem:[%s3304_s10 + $0x3e0] sm:$0xff] }
 0x13d   : > { %2777 = vmatmul.msk.f32.gmra.mxu3 %vm1674_vm0, %v2950_v52  ;;  %v2954_v62 = vpop.eup %2953  ;;  %2965 = vpow2.f32 %v1608_v10  ;;  %v1178_v19 = vmul.f32 %v3721_v53, %v1046_v22  ;;  %v1200_v39 = vmul.f32 %v3721_v53, %v1068_v26  ;;  %v1224_v50 = vmul.f32 %v3721_v53, %v1092_v31 }
 0x13e   : > { %v1223_v1 = vmul.f32 %v3721_v53, %v1091_v25  ;;  %v2956_v9 = vpop.eup %2955  ;;  %v1610_v33 = vmul.f32 1.442695, %v1382_v37  ;;  %v1255_v40 = vmul.f32 %v3721_v53, %v1123_v14  ;;  %2967 = vpow2.f32 %v1456_v38 }
 0x13f   : > { %v2958_v23 = vpop.eup %2957  ;;  %v1047_v58 = vsub.f32 %v3471_v49, %v3714_v44  ;;  %v1069_v4 = vsub.f32 %v3522_v32, %v3714_v44  ;;  %v1328_v28 = vmul.f32 %v1200_v39, %v1068_v26  ;;  %2969 = vpow2.f32 %v1500_v51  ;;  %v343_v49 = vld [vmem:[%s3304_s10 + $0x2e8] sm:$0xff] }
 0x140   : > { %836 = vperm.xlu2 %2873, %v341_v36   ;;  %671 = vperm.xlu1 %2872, %v308_v0   ;;  %v1351_v46 = vmul.f32 %v1223_v1, %v1091_v25  ;;  %v2960_v27 = vpop.eup %2959  ;;  %v1306_v25 = vmul.f32 %v1178_v19, %v1046_v22  ;;  %2971 = vpow2.f32 %v1610_v33  ;;  %v1352_v5 = vmul.f32 %v1224_v50, %v1092_v31  ;;  %v311_v33 = vld [vmem:[%s3304_s10 + $0x1e8] sm:$0xff] }
 0x141   : > { %v2091_v42 = vpop.f32.mrf.mxu0  ;;  %991 = vperm.xlu0 %2871, %v372_v21   ;;  %v2962_v56 = vpop.eup %2961  ;;  %v1383_v48 = vmul.f32 %v1255_v40, %v1123_v14  ;;  %v1201_v10 = vmul.f32 %v3721_v53, %v1069_v4  ;;  %v1502_v1 = vmul.f32 1.442695, %v1328_v28  ;;  %v1048_v14 = vsub.f32 %v3431_v47, %v3714_v44 }
 0x142   : > { %v2092_v17 = vadd.f32 %v3617_v57, %v2091_v42  ;;  %v737_v20 = vpop.permute.xlu1 %736  ;;  %v1548_v54 = vmul.f32 1.442695, %v1351_v46  ;;  %v2964_v0 = vpop.eup %2963  ;;  %v1179_v42 = vmul.f32 %v3721_v53, %v1047_v58  ;;  %v1550_v59 = vmul.f32 1.442695, %v1352_v5 }
 0x143   : > { %2747 = vmatmul.msk.f32.gmra.mxu2 %vm1674_vm0, %v2956_v9  ;;  %v892_v52 = vpop.permute.xlu0 %891  ;;  %v2966_v21 = vpop.eup %2965  ;;  %v1093_v6 = vsub.f32 %v737_v20, %v3714_v44  ;;  %v1612_v29 = vmul.f32 1.442695, %v1383_v48  ;;  %v1329_v19 = vmul.f32 %v1201_v10, %v1069_v4  ;;  %v1070_v39 = vsub.f32 %v3585_v16, %v3714_v44  ;;  %v375_v16 = vld [vmem:[%s3304_s10 + $0x3e8] sm:$0xff] }
 0x144   : > { %2465 = vst [vmem:[%s3631_s13 + $0x28] sm:$0xff] %v2092_v17  ;;  %2701 = vmatmul.msk.f32.gmra.mxu0 %vm1674_vm0, %v2952_v7  ;;  %2723 = vmatmul.msk.f32.gmra.mxu1 %vm1674_vm0, %v2954_v62  ;;  %v310_v7 = vld [vmem:[%s3304_s10 + $0x1e0] sm:$0xff]  ;;  %2973 = vpow2.f32 %v1548_v54  ;;  %v1124_v32 = vsub.f32 %v892_v52, %v3714_v44  ;;  %v1458_v62 = vmul.f32 1.442695, %v1306_v25  ;;  %v897_v17 = vpop.permute.xlu2 %896  ;;  %v2968_v9 = vpop.eup %2967  ;;  %v1307_v46 = vmul.f32 %v1179_v42, %v1047_v58 }
 0x145   : > { %2778 = vmatmul.msk.f32.gmra.mxu3 %vm1674_vm0, %v2958_v23  ;;  %v1225_v22 = vmul.f32 %v3721_v53, %v1093_v6  ;;  %v2970_v26 = vpop.eup %2969  ;;  %v1125_v47 = vsub.f32 %v897_v17, %v3714_v44  ;;  %v1504_v40 = vmul.f32 1.442695, %v1329_v19  ;;  %v1202_v54 = vmul.f32 %v3721_v53, %v1070_v39 }
 0x146   : > { %v1256_v37 = vmul.f32 %v3721_v53, %v1124_v32  ;;  %2975 = vpow2.f32 %v1458_v62  ;;  %v1071_v42 = vsub.f32 %v3583_v12, %v3714_v44 }
 0x147   : > { %2977 = vpow2.f32 %v1502_v1  ;;  %v1353_v51 = vmul.f32 %v1225_v22, %v1093_v6  ;;  %v1330_v62 = vmul.f32 %v1202_v54, %v1070_v39  ;;  %v312_v1 = vld [vmem:[%s3304_s10 + $0x1f0] sm:$0xff]  ;;  %v1050_v39 = vsub.f32 %v3485_v43, %v3714_v44  ;;  %v313_v43 = vld [vmem:[%s3304_s10 + $0x1f8] sm:$0xff] }
 0x148   : > { %841 = vperm.xlu2 %2873, %v342_v30   ;;  %676 = vperm.xlu1 %2872, %v309_v13   ;;  %v2972_v13 = vpop.eup %2971  ;;  %2979 = vpow2.f32 %v1550_v59  ;;  %v1384_v50 = vmul.f32 %v1256_v37, %v1124_v32  ;;  %v1049_v32 = vsub.f32 %v3487_v45, %v3714_v44  ;;  %v345_v45 = vld [vmem:[%s3304_s10 + $0x2f8] sm:$0xff]  ;;  %v1203_v22 = vmul.f32 %v3721_v53, %v1071_v42 }
 0x149   : > { %v2094_v24 = vpop.f32.mrf.mxu0  ;;  %996 = vperm.xlu0 %2871, %v373_v34   ;;  %2981 = vpow2.f32 %v1612_v29  ;;  %v1552_v58 = vmul.f32 1.442695, %v1353_v51 }
 0x14a   : > { %v2095_v35 = vadd.f32 %v3617_v57, %v2094_v24  ;;  %v3747_v36 = vpop.permute.xlu1 %901  ;;  %v2974_v38 = vpop.eup %2973  ;;  %v1180_v24 = vmul.f32 %v3721_v53, %v1048_v14  ;;  %v1614_v28 = vmul.f32 1.442695, %v1384_v50  ;;  %v1181_v59 = vmul.f32 %v3721_v53, %v1049_v32 }
 0x14b   : > { %2748 = vmatmul.msk.f32.gmra.mxu2 %vm1674_vm0, %v2964_v0  ;;  %v742_v34 = vpop.permute.xlu0 %741  ;;  %v1257_v0 = vmul.f32 %v3721_v53, %v1125_v47  ;;  %v1126_v12 = vsub.f32 %v3747_v36, %v3714_v44 }
 0x14c   : > { %2466 = vst [vmem:[%s3631_s13 + $0x30] sm:$0xff] %v2095_v35  ;;  %2702 = vmatmul.msk.f32.gmra.mxu0 %vm1674_vm0, %v2960_v27  ;;  %2724 = vmatmul.msk.f32.gmra.mxu1 %vm1674_vm0, %v2962_v56  ;;  %v344_v27 = vld [vmem:[%s3304_s10 + $0x2f0] sm:$0xff]  ;;  %v1094_v52 = vsub.f32 %v742_v34, %v3714_v44  ;;  %v1460_v56 = vmul.f32 1.442695, %v1307_v46  ;;  %v2976_v35 = vpop.eup %2975  ;;  %v747_v4 = vpop.permute.xlu2 %746  ;;  %v1308_v48 = vmul.f32 %v1180_v24, %v1048_v14 }
 0x14d   : > { %2779 = vmatmul.msk.f32.gmra.mxu3 %vm1674_vm0, %v2966_v21  ;;  %v2978_v21 = vpop.eup %2977  ;;  %v1095_v10 = vsub.f32 %v747_v4, %v3714_v44  ;;  %v1258_v36 = vmul.f32 %v3721_v53, %v1126_v12 }
 0x14e   : > { %v1226_v5 = vmul.f32 %v3721_v53, %v1094_v52  ;;  %2983 = vpow2.f32 %v1460_v56  ;;  %v377_v56 = vld [vmem:[%s3304_s10 + $0x3f8] sm:$0xff] }
 0x14f   : > { %v2172_v15 = vpop.f32.mrf.mxu1  ;;  %2985 = vpow2.f32 %v1504_v40  ;;  %v1227_v37 = vmul.f32 %v3721_v53, %v1095_v10  ;;  %v1182_v40 = vmul.f32 %v3721_v53, %v1050_v39 }
 0x150   : > { %v2173_v20 = vadd.f32 %v3617_v57, %v2172_v15  ;;  %846 = vperm.xlu2 %2873, %v343_v49   ;;  %681 = vperm.xlu1 %2872, %v310_v7   ;;  %v2980_v7 = vpop.eup %2979  ;;  %v1385_v15 = vmul.f32 %v1257_v0, %v1125_v47  ;;  %2987 = vpow2.f32 %v1552_v58  ;;  %v1354_v17 = vmul.f32 %v1226_v5, %v1094_v52 }
 0x151   : > { %v2097_v23 = vpop.f32.mrf.mxu0  ;;  %1001 = vperm.xlu0 %2871, %v374_v11   ;;  %v2982_v11 = vpop.eup %2981  ;;  %2989 = vpow2.f32 %v1614_v28  ;;  %v1309_v47 = vmul.f32 %v1181_v59, %v1049_v32  ;;  %v1355_v52 = vmul.f32 %v1227_v37, %v1095_v10  ;;  %v1051_v32 = vsub.f32 %v3443_v61, %v3714_v44 }
 0x152   : > { %v2098_v31 = vadd.f32 %v3617_v57, %v2097_v23  ;;  %2492 = vst [vmem:[%s3631_s13 + $0x100] sm:$0xff] %v2173_v20  ;;  %v3770_v30 = vpop.permute.xlu1 %751  ;;  %v376_v20 = vld [vmem:[%s3304_s10 + $0x3f0] sm:$0xff]  ;;  %v1506_v23 = vmul.f32 1.442695, %v1330_v62  ;;  %v1616_v29 = vmul.f32 1.442695, %v1385_v15  ;;  %v1073_v10 = vsub.f32 %v3601_v41, %v3714_v44 }
 0x153   : > { %2749 = vmatmul.msk.f32.gmra.mxu2 %vm1674_vm0, %v2974_v38  ;;  %v1554_v46 = vmul.f32 1.442695, %v1354_v17  ;;  %v1464_v54 = vmul.f32 1.442695, %v1309_v47  ;;  %v1183_v41 = vmul.f32 %v3721_v53, %v1051_v32  ;;  %v1052_v47 = vsub.f32 %v3500_v2, %v3714_v44 }
 0x154   : > { %2467 = vst [vmem:[%s3631_s13 + $0x38] sm:$0xff] %v2098_v31  ;;  %2703 = vmatmul.msk.f32.gmra.mxu0 %vm1674_vm0, %v2968_v9  ;;  %2725 = vmatmul.msk.f32.gmra.mxu1 %vm1674_vm0, %v2970_v26  ;;  %v1462_v9 = vmul.f32 1.442695, %v1308_v48  ;;  %v2984_v26 = vpop.eup %2983  ;;  %v907_v31 = vpop.permute.xlu0 %906  ;;  %v1205_v59 = vmul.f32 %v3721_v53, %v1073_v10 }
 0x155   : > { %2780 = vmatmul.msk.f32.gmra.mxu3 %vm1674_vm0, %v2972_v13  ;;  %v2986_v14 = vpop.eup %2985  ;;  %v912_v50 = vpop.permute.xlu2 %911  ;;  %v1127_v24 = vsub.f32 %v907_v31, %v3714_v44 }
 0x156   : > { %v2988_v19 = vpop.eup %2987  ;;  %2991 = vpow2.f32 %v1462_v9 }
 0x157   : > { %v2990_v51 = vpop.eup %2989  ;;  %2993 = vpow2.f32 %v1506_v23  ;;  %v1259_v5 = vmul.f32 %v3721_v53, %v1127_v24 }
 0x158   : > { %851 = vperm.xlu2 %2873, %v344_v27   ;;  %686 = vperm.xlu1 %2872, %v311_v33   ;;  %v1072_v27 = vsub.f32 %v3534_v63, %v3714_v44  ;;  %v1331_v33 = vmul.f32 %v1203_v22, %v1071_v42  ;;  %2995 = vpow2.f32 %v1616_v29  ;;  %v1386_v63 = vmul.f32 %v1258_v36, %v1126_v12 }
 0x159   : > { %v2100_v25 = vpop.f32.mrf.mxu0  ;;  %1006 = vperm.xlu0 %2871, %v375_v16   ;;  %v1096_v16 = vsub.f32 %v3770_v30, %v3714_v44  ;;  %2997 = vpow2.f32 %v1554_v46  ;;  %v1387_v12 = vmul.f32 %v1259_v5, %v1127_v24 }
 0x15a   : > { %v2101_v6 = vadd.f32 %v3617_v57, %v2100_v25  ;;  %v3791_v49 = vpop.permute.xlu1 %916  ;;  %v1508_v0 = vmul.f32 1.442695, %v1331_v33  ;;  %v1556_v25 = vmul.f32 1.442695, %v1355_v52  ;;  %v1618_v28 = vmul.f32 1.442695, %v1386_v63 }
 0x15b   : > { %2750 = vmatmul.msk.f32.gmra.mxu2 %vm1674_vm0, %v2980_v7  ;;  %v1228_v30 = vmul.f32 %v3721_v53, %v1096_v16  ;;  %2999 = vpow2.f32 %v1464_v54  ;;  %v1333_v33 = vmul.f32 %v1205_v59, %v1073_v10  ;;  %v1129_v2 = vsub.f32 %v3791_v49, %v3714_v44 }
 0x15c   : > { %2468 = vst [vmem:[%s3631_s13 + $0x40] sm:$0xff] %v2101_v6  ;;  %2704 = vmatmul.msk.f32.gmra.mxu0 %vm1674_vm0, %v2976_v35  ;;  %2726 = vmatmul.msk.f32.gmra.mxu1 %vm1674_vm0, %v2978_v21  ;;  %v1204_v35 = vmul.f32 %v3721_v53, %v1072_v27  ;;  %v2992_v58 = vpop.eup %2991  ;;  %v757_v42 = vpop.permute.xlu0 %756  ;;  %3001 = vpow2.f32 %v1508_v0  ;;  %v1184_v63 = vmul.f32 %v3721_v53, %v1052_v47 }
 0x15d   : > { %2781 = vmatmul.msk.f32.gmra.mxu3 %vm1674_vm0, %v2982_v11  ;;  %v2994_v4 = vpop.eup %2993  ;;  %v1310_v11 = vmul.f32 %v1182_v40, %v1050_v39  ;;  %3003 = vpow2.f32 %v1556_v25  ;;  %v762_v61 = vpop.permute.xlu2 %761  ;;  %v1097_v17 = vsub.f32 %v757_v42, %v3714_v44  ;;  %v1311_v39 = vmul.f32 %v1183_v41, %v1051_v32 }
 0x15e   : > { %v2996_v48 = vpop.eup %2995  ;;  %v1332_v15 = vmul.f32 %v1204_v35, %v1072_v27  ;;  %3005 = vpow2.f32 %v1618_v28  ;;  %v1074_v27 = vsub.f32 %v3599_v3, %v3714_v44  ;;  %v1098_v52 = vsub.f32 %v762_v61, %v3714_v44 }
 0x15f   : > { %v2998_v62 = vpop.eup %2997  ;;  %v1312_v32 = vmul.f32 %v1184_v63, %v1052_v47  ;;  %v1075_v42 = vsub.f32 %v3550_v18, %v3714_v44 }
 0x160   : > { %856 = vperm.xlu2 %2873, %v345_v45   ;;  %691 = vperm.xlu1 %2872, %v312_v1   ;;  %v1128_v45 = vsub.f32 %v912_v50, %v3714_v44  ;;  %v1356_v1 = vmul.f32 %v1228_v30, %v1096_v16  ;;  %v1510_v9 = vmul.f32 1.442695, %v1332_v15  ;;  %v1206_v24 = vmul.f32 %v3721_v53, %v1074_v27 }
 0x161   : > { %v2103_v13 = vpop.f32.mrf.mxu0  ;;  %1011 = vperm.xlu0 %2871, %v376_v20   ;;  %v1466_v20 = vmul.f32 1.442695, %v1310_v11  ;;  %v3000_v22 = vpop.eup %2999  ;;  %v1230_v0 = vmul.f32 %v3721_v53, %v1098_v52  ;;  %v1207_v61 = vmul.f32 %v3721_v53, %v1075_v42 }
 0x162   : > { %v2104_v34 = vadd.f32 %v3617_v57, %v2103_v13  ;;  %v3813_v38 = vpop.permute.xlu1 %766  ;;  %v1260_v23 = vmul.f32 %v3721_v53, %v1128_v45  ;;  %v3002_v31 = vpop.eup %3001  ;;  %v1620_v13 = vmul.f32 1.442695, %v1387_v12 }
 0x163   : > { %2751 = vmatmul.msk.f32.gmra.mxu2 %vm1674_vm0, %v2988_v19  ;;  %v3004_v19 = vpop.eup %3003  ;;  %3007 = vpow2.f32 %v1466_v20  ;;  %v1358_v15 = vmul.f32 %v1230_v0, %v1098_v52  ;;  %v1099_v10 = vsub.f32 %v3813_v38, %v3714_v44 }
 0x164   : > { %2469 = vst [vmem:[%s3631_s13 + $0x48] sm:$0xff] %v2104_v34  ;;  %2705 = vmatmul.msk.f32.gmra.mxu0 %vm1674_vm0, %v2984_v26  ;;  %2727 = vmatmul.msk.f32.gmra.mxu1 %vm1674_vm0, %v2986_v14  ;;  %v1558_v26 = vmul.f32 1.442695, %v1356_v1  ;;  %v1229_v14 = vmul.f32 %v3721_v53, %v1097_v17  ;;  %3009 = vpow2.f32 %v1510_v9  ;;  %v1388_v50 = vmul.f32 %v1260_v23, %v1128_v45  ;;  %v922_v16 = vpop.permute.xlu0 %921 }
 0x165   : > { %2782 = vmatmul.msk.f32.gmra.mxu3 %vm1674_vm0, %v2990_v51  ;;  %v3006_v51 = vpop.eup %3005  ;;  %v927_v40 = vpop.permute.xlu2 %926  ;;  %v1130_v18 = vsub.f32 %v922_v16, %v3714_v44  ;;  %v1470_v1 = vmul.f32 1.442695, %v1312_v32  ;;  %v1562_v20 = vmul.f32 1.442695, %v1358_v15  ;;  %v1231_v38 = vmul.f32 %v3721_v53, %v1099_v10 }
 0x166   : > { %3011 = vpow2.f32 %v1558_v26  ;;  %v1357_v3 = vmul.f32 %v1229_v14, %v1097_v17  ;;  %v1622_v35 = vmul.f32 1.442695, %v1388_v50  ;;  %v1131_v47 = vsub.f32 %v927_v40, %v3714_v44 }
 0x167   : > { %3013 = vpow2.f32 %v1620_v13 }
 0x168   : > { %696 = vperm.xlu1 %2872, %v313_v43   ;;  %v1468_v43 = vmul.f32 1.442695, %v1311_v39  ;;  %v1560_v49 = vmul.f32 1.442695, %v1357_v3  ;;  %v1076_v39 = vsub.f32 %v3629_v55, %v3714_v44 }
 0x169   : > { %v2106_v21 = vpop.f32.mrf.mxu0  ;;  %1016 = vperm.xlu0 %2871, %v377_v56   ;;  %v1512_v56 = vmul.f32 1.442695, %v1333_v33  ;;  %v3008_v54 = vpop.eup %3007 }
 0x16a   : > { %v2107_v6 = vadd.f32 %v3617_v57, %v2106_v21  ;;  %v3834_v7 = vpop.permute.xlu1 %931  ;;  %v3010_v30 = vpop.eup %3009  ;;  %v1261_v21 = vmul.f32 %v3721_v53, %v1129_v2  ;;  %3015 = vpow2.f32 %v1468_v43  ;;  %v1208_v50 = vmul.f32 %v3721_v53, %v1076_v39 }
 0x16b   : > { %2752 = vmatmul.msk.f32.gmra.mxu2 %vm1674_vm0, %v2998_v62  ;;  %v1334_v62 = vmul.f32 %v1206_v24, %v1074_v27  ;;  %3017 = vpow2.f32 %v1512_v56 }
 0x16c   : > { %2470 = vst [vmem:[%s3631_s13 + $0x50] sm:$0xff] %v2107_v6  ;;  %2706 = vmatmul.msk.f32.gmra.mxu0 %vm1674_vm0, %v2992_v58  ;;  %2728 = vmatmul.msk.f32.gmra.mxu1 %vm1674_vm0, %v2994_v4  ;;  %v3012_v6 = vpop.eup %3011  ;;  %3019 = vpow2.f32 %v1622_v35  ;;  %v772_v17 = vpop.permute.xlu0 %771 }
 0x16d   : > { %2783 = vmatmul.msk.f32.gmra.mxu3 %vm1674_vm0, %v2996_v48  ;;  %v1053_v48 = vsub.f32 %v3498_v60, %v3714_v44  ;;  %v3014_v11 = vpop.eup %3013  ;;  %v1389_v60 = vmul.f32 %v1261_v21, %v1129_v2  ;;  %3021 = vpow2.f32 %v1560_v49  ;;  %v1514_v12 = vmul.f32 1.442695, %v1334_v62  ;;  %v777_v23 = vpop.permute.xlu2 %776 }
 0x16e   : > { %3023 = vpow2.f32 %v1470_v1  ;;  %v1100_v27 = vsub.f32 %v772_v17, %v3714_v44  ;;  %v1263_v2 = vmul.f32 %v3721_v53, %v1131_v47  ;;  %v1077_v21 = vsub.f32 %v3625_v8, %v3714_v44 }
 0x16f   : > { %v1185_v45 = vmul.f32 %v3721_v53, %v1053_v48  ;;  %v1624_v26 = vmul.f32 1.442695, %v1389_v60  ;;  %3025 = vpow2.f32 %v1514_v12  ;;  %v1336_v49 = vmul.f32 %v1208_v50, %v1076_v39 }
 0x170   : > { %v3016_v41 = vpop.eup %3015  ;;  %3027 = vpow2.f32 %v1562_v20  ;;  %v1232_v56 = vmul.f32 %v3721_v53, %v1100_v27  ;;  %v1132_v8 = vsub.f32 %v3834_v7, %v3714_v44  ;;  %v1209_v32 = vmul.f32 %v3721_v53, %v1077_v21 }
 0x171   : > { %v2109_v29 = vpop.f32.mrf.mxu0  ;;  %v2175_v37 = vpop.f32.mrf.mxu1  ;;  %3029 = vpow2.f32 %v1624_v26 }
 0x172   : > { %v2110_v36 = vadd.f32 %v3617_v57, %v2109_v29  ;;  %v2176_v46 = vadd.f32 %v3617_v57, %v2175_v37  ;;  %v3853_v34 = vpop.permute.xlu1 %781  ;;  %v1262_v29 = vmul.f32 %v3721_v53, %v1130_v18  ;;  %v1337_v20 = vmul.f32 %v1209_v32, %v1077_v21 }
 0x173   : > { %2753 = vmatmul.msk.f32.gmra.mxu2 %vm1674_vm0, %v3004_v19  ;;  %v1335_v19 = vmul.f32 %v1207_v61, %v1075_v42 }
 0x174   : > { %2471 = vst [vmem:[%s3631_s13 + $0x58] sm:$0xff] %v2110_v36  ;;  %2707 = vmatmul.msk.f32.gmra.mxu0 %vm1674_vm0, %v3000_v22  ;;  %2729 = vmatmul.msk.f32.gmra.mxu1 %vm1674_vm0, %v3002_v31  ;;  %v3018_v22 = vpop.eup %3017  ;;  %v1313_v36 = vmul.f32 %v1185_v45, %v1053_v48  ;;  %v937_v40 = vpop.permute.xlu0 %936  ;;  %v1360_v48 = vmul.f32 %v1232_v56, %v1100_v27 }
 0x175   : > { %2493 = vst [vmem:[%s3631_s13 + $0x108] sm:$0xff] %v2176_v46  ;;  %2784 = vmatmul.msk.f32.gmra.mxu3 %vm1674_vm0, %v3006_v51  ;;  %v3020_v14 = vpop.eup %3019  ;;  %v1390_v51 = vmul.f32 %v1262_v29, %v1130_v18  ;;  %v1516_v55 = vmul.f32 1.442695, %v1335_v19  ;;  %v1264_v45 = vmul.f32 %v3721_v53, %v1132_v8  ;;  %v1133_v29 = vsub.f32 %v937_v40, %v3714_v44 }
 0x176   : > { %v3022_v46 = vpop.eup %3021  ;;  %v1472_v33 = vmul.f32 1.442695, %v1313_v36  ;;  %v1566_v1 = vmul.f32 1.442695, %v1360_v48 }
 0x177   : > { %v3024_v52 = vpop.eup %3023  ;;  %v1626_v24 = vmul.f32 1.442695, %v1390_v51  ;;  %v1392_v26 = vmul.f32 %v1264_v45, %v1132_v8 }
 0x178   : > { %v3026_v63 = vpop.eup %3025  ;;  %3031 = vpow2.f32 %v1472_v33 }
 0x179   : > { %v2112_v58 = vpop.f32.mrf.mxu0  ;;  %v2178_v25 = vpop.f32.mrf.mxu1  ;;  %3033 = vpow2.f32 %v1516_v55  ;;  %v1630_v39 = vmul.f32 1.442695, %v1392_v26 }
 0x17a   : > { %v2113_v4 = vadd.f32 %v3617_v57, %v2112_v58  ;;  %v2179_v28 = vadd.f32 %v3617_v57, %v2178_v25  ;;  %v3874_v5 = vpop.permute.xlu1 %946  ;;  %v3028_v25 = vpop.eup %3027 }
 0x17b   : > { %2754 = vmatmul.msk.f32.gmra.mxu2 %vm1674_vm0, %v3012_v6  ;;  %v1101_v6 = vsub.f32 %v777_v23, %v3714_v44 }
 0x17c   : > { %2472 = vst [vmem:[%s3631_s13 + $0x60] sm:$0xff] %v2113_v4  ;;  %2708 = vmatmul.msk.f32.gmra.mxu0 %vm1674_vm0, %v3008_v54  ;;  %2730 = vmatmul.msk.f32.gmra.mxu1 %vm1674_vm0, %v3010_v30  ;;  %v3913_v54 = vld [vmem:[%s4410_s4] ss:$0 sm:$0xff]  ;;  %v3030_v30 = vpop.eup %3029  ;;  %v3921_v4 = vpop.permute.xlu2 %941 }
 0x17d   : > { %2494 = vst [vmem:[%s3631_s13 + $0x110] sm:$0xff] %v2179_v28  ;;  %2785 = vmatmul.msk.f32.gmra.mxu3 %vm1674_vm0, %v3014_v11  ;;  %v1391_v28 = vmul.f32 %v1263_v2, %v1131_v47  ;;  %v1518_v11 = vmul.f32 1.442695, %v1336_v49  ;;  %v1233_v15 = vmul.f32 %v3721_v53, %v1101_v6  ;;  %v1265_v47 = vmul.f32 %v3721_v53, %v1133_v29 }
 0x17e   : > { %v3032_v42 = vpop.eup %3031  ;;  %v1134_v50 = vsub.f32 %v3921_v4, %v3714_v44 }
 0x17f   : > { %v1628_v62 = vmul.f32 1.442695, %v1391_v28  ;;  %v3034_v18 = vpop.eup %3033  ;;  %v1393_v2 = vmul.f32 %v1265_v47, %v1133_v29 }
 0x181   : > { %v2115_v9 = vpop.f32.mrf.mxu0  ;;  %v2181_v59 = vpop.f32.mrf.mxu1 }
 0x182   : > { %v2116_v37 = vadd.f32 %v3617_v57, %v2115_v9  ;;  %v2182_v31 = vadd.f32 %v3617_v57, %v2181_v59  ;;  %v3895_v13 = vpop.permute.xlu1 %796  ;;  %v1359_v57 = vmul.f32 %v1231_v38, %v1099_v10  ;;  %v787_v38 = vpop.permute.xlu0 %786  ;;  %v1361_v9 = vmul.f32 %v1233_v15, %v1101_v6 }
 0x183   : > { %2755 = vmatmul.msk.f32.gmra.mxu2 %vm1674_vm0, %v3022_v46  ;;  %v1102_v59 = vsub.f32 %v3853_v34, %v3714_v44 }
 0x184   : > { %2473 = vst [vmem:[%s3631_s13 + $0x68] sm:$0xff] %v2116_v37  ;;  %2709 = vmatmul.msk.f32.gmra.mxu0 %vm1674_vm0, %v3016_v41  ;;  %2731 = vmatmul.msk.f32.gmra.mxu1 %vm1674_vm0, %v3018_v22  ;;  %v1564_v3 = vmul.f32 1.442695, %v1359_v57  ;;  %v792_v23 = vpop.permute.xlu2 %791 }
 0x185   : > { %2495 = vst [vmem:[%s3631_s13 + $0x118] sm:$0xff] %v2182_v31  ;;  %2786 = vmatmul.msk.f32.gmra.mxu3 %vm1674_vm0, %v3020_v14  ;;  %v1520_v31 = vmul.f32 1.442695, %v1337_v20  ;;  %v1568_v14 = vmul.f32 1.442695, %v1361_v9  ;;  %v1234_v36 = vmul.f32 %v3721_v53, %v1102_v59  ;;  %v1104_v28 = vsub.f32 %v792_v23, %v3714_v44 }
 0x186   : > { %3035 = vpow2.f32 %v1564_v3  ;;  %v1103_v3 = vsub.f32 %v787_v38, %v3714_v44  ;;  %v1105_v23 = vsub.f32 %v3895_v13, %v3714_v44 }
 0x187   : > { %3037 = vpow2.f32 %v1626_v24 }
 0x188   : > { %3039 = vpow2.f32 %v1518_v11  ;;  %v1135_v11 = vsub.f32 %v3874_v5, %v3714_v44 }
 0x189   : > { %v2118_v16 = vpop.f32.mrf.mxu0  ;;  %v2184_v43 = vpop.f32.mrf.mxu1  ;;  %3041 = vpow2.f32 %v1628_v62  ;;  %v1236_v62 = vmul.f32 %v3721_v53, %v1104_v28 }
 0x18a   : > { %v2119_v35 = vadd.f32 %v3913_v54, %v2118_v16  ;;  %v2185_v0 = vadd.f32 %v3913_v54, %v2184_v43  ;;  %v3917_v58 = vpop.permute.xlu1 %961  ;;  %3043 = vpow2.f32 %v1566_v1  ;;  %v952_v16 = vpop.permute.xlu0 %951 }
 0x18b   : > { %2756 = vmatmul.msk.f32.gmra.mxu2 %vm1674_vm0, %v3028_v25  ;;  %3045 = vpow2.f32 %v1520_v31  ;;  %v1235_v25 = vmul.f32 %v3721_v53, %v1103_v3  ;;  %v1364_v38 = vmul.f32 %v1236_v62, %v1104_v28 }
 0x18c   : > { %2474 = vst [vmem:[%s3631_s13 + $0x70] sm:$0xff] %v2119_v35  ;;  %2710 = vmatmul.msk.f32.gmra.mxu0 %vm1674_vm0, %v3024_v52  ;;  %2732 = vmatmul.msk.f32.gmra.mxu1 %vm1674_vm0, %v3026_v63  ;;  %v3036_v17 = vpop.eup %3035  ;;  %3047 = vpow2.f32 %v1568_v14  ;;  %v1362_v52 = vmul.f32 %v1234_v36, %v1102_v59  ;;  %v3964_v43 = vpop.permute.xlu2 %956  ;;  %v1266_v63 = vmul.f32 %v3721_v53, %v1134_v50 }
 0x18d   : > { %2496 = vst [vmem:[%s3631_s13 + $0x120] sm:$0xff] %v2185_v0  ;;  %2787 = vmatmul.msk.f32.gmra.mxu3 %vm1674_vm0, %v3030_v30  ;;  %v3038_v41 = vpop.eup %3037  ;;  %3049 = vpow2.f32 %v1630_v39  ;;  %v1632_v0 = vmul.f32 1.442695, %v1393_v2  ;;  %v1574_v31 = vmul.f32 1.442695, %v1364_v38  ;;  %v1237_v36 = vmul.f32 %v3721_v53, %v1105_v23 }
 0x18e   : > { %v3040_v19 = vpop.eup %3039  ;;  %v1570_v24 = vmul.f32 1.442695, %v1362_v52  ;;  %v1394_v48 = vmul.f32 %v1266_v63, %v1134_v50 }
 0x18f   : > { %v3042_v33 = vpop.eup %3041  ;;  %v1365_v63 = vmul.f32 %v1237_v36, %v1105_v23 }
 0x190   : > { %v3044_v55 = vpop.eup %3043  ;;  %3051 = vpow2.f32 %v1570_v24 }
 0x191   : > { %v2121_v10 = vpop.f32.mrf.mxu0  ;;  %v2187_v60 = vpop.f32.mrf.mxu1  ;;  %3053 = vpow2.f32 %v1632_v0 }
 0x192   : > { %v2122_v61 = vadd.f32 %v3913_v54, %v2121_v10  ;;  %v2188_v7 = vadd.f32 %v3913_v54, %v2187_v60  ;;  %v3937_v12 = vpop.permute.xlu1 %811  ;;  %v3046_v35 = vpop.eup %3045  ;;  %v1634_v60 = vmul.f32 1.442695, %v1394_v48 }
 0x193   : > { %2757 = vmatmul.msk.f32.gmra.mxu2 %vm1674_vm0, %v3036_v17  ;;  %v3048_v4 = vpop.eup %3047  ;;  %v802_v10 = vpop.permute.xlu0 %801 }
 0x194   : > { %2475 = vst [vmem:[%s3631_s13 + $0x78] sm:$0xff] %v2122_v61  ;;  %2711 = vmatmul.msk.f32.gmra.mxu0 %vm1674_vm0, %v3032_v42  ;;  %2733 = vmatmul.msk.f32.gmra.mxu1 %vm1674_vm0, %v3034_v18  ;;  %v3050_v8 = vpop.eup %3049  ;;  %v1363_v42 = vmul.f32 %v1235_v25, %v1103_v3  ;;  %v1267_v61 = vmul.f32 %v3721_v53, %v1135_v11  ;;  %v3984_v9 = vpop.permute.xlu2 %806 }
 0x195   : > { %2497 = vst [vmem:[%s3631_s13 + $0x128] sm:$0xff] %v2188_v7  ;;  %2788 = vmatmul.msk.f32.gmra.mxu3 %vm1674_vm0, %v3038_v41  ;;  %v2268_v22 = vpop.f32.mrf.mxu2 }
 0x196   : > { %v2269_v37 = vadd.f32 %v3913_v54, %v2268_v22  ;;  %v1572_v7 = vmul.f32 1.442695, %v1363_v42  ;;  %v3052_v5 = vpop.eup %3051  ;;  %v1395_v29 = vmul.f32 %v1267_v61, %v1135_v11 }
 0x197   : > { %v3054_v22 = vpop.eup %3053 }
 0x198   : > { %2524 = vst [vmem:[%s3631_s13 + $0x200] sm:$0xff] %v2269_v37  ;;  %v1136_v37 = vsub.f32 %v952_v16, %v3714_v44  ;;  %v1636_v39 = vmul.f32 1.442695, %v1395_v29 }
 0x199   : > { %v2124_v34 = vpop.f32.mrf.mxu0  ;;  %v2190_v46 = vpop.f32.mrf.mxu1 }
 0x19a   : > { %v2125_v57 = vadd.f32 %v3913_v54, %v2124_v34  ;;  %v2191_v51 = vadd.f32 %v3913_v54, %v2190_v46  ;;  %v3954_v27 = vpop.permute.xlu1 %976  ;;  %v1268_v47 = vmul.f32 %v3721_v53, %v1136_v37 }
 0x19b   : > { %2758 = vmatmul.msk.f32.gmra.mxu2 %vm1674_vm0, %v3044_v55  ;;  %v3999_v50 = vpop.permute.xlu0 %966 }
 0x19c   : > { %2476 = vst [vmem:[%s3631_s13 + $0x80] sm:$0xff] %v2125_v57  ;;  %2734 = vmatmul.msk.f32.gmra.mxu1 %vm1674_vm0, %v3040_v19  ;;  %v4011_v16 = vpop.permute.xlu2 %971 }
 0x19d   : > { %2498 = vst [vmem:[%s3631_s13 + $0x130] sm:$0xff] %v2191_v51  ;;  %2789 = vmatmul.msk.f32.gmra.mxu3 %vm1674_vm0, %v3042_v33 }
 0x1a1   : > { %v2127_v56 = vpop.f32.mrf.mxu0  ;;  %v2193_v40 = vpop.f32.mrf.mxu1 }
 0x1a2   : > { %v2128_v30 = vadd.f32 %v3913_v54, %v2127_v56  ;;  %v2194_v21 = vadd.f32 %v3913_v54, %v2193_v40  ;;  %v662_v49 = vpop.permute.xlu1 %661  ;;  %v1396_v56 = vmul.f32 %v1268_v47, %v1136_v37 }
 0x1a3   : > { %v1078_v6 = vsub.f32 %v662_v49, %v3714_v44  ;;  %2759 = vmatmul.msk.f32.gmra.mxu2 %vm1674_vm0, %v3048_v4  ;;  %v1576_v49 = vmul.f32 1.442695, %v1365_v63 }
 0x1a4   : > { %2477 = vst [vmem:[%s3631_s13 + $0x88] sm:$0xff] %v2128_v30  ;;  %2735 = vmatmul.msk.f32.gmra.mxu1 %vm1674_vm0, %v3046_v35 }
 0x1a5   : > { %2499 = vst [vmem:[%s3631_s13 + $0x138] sm:$0xff] %v2194_v21  ;;  %v1210_v32 = vmul.f32 %v3721_v53, %v1078_v6  ;;  %2790 = vmatmul.msk.f32.gmra.mxu3 %vm1674_vm0, %v3050_v8 }
 0x1a7   : > { %v1338_v15 = vmul.f32 %v1210_v32, %v1078_v6  ;;  %v1638_v32 = vmul.f32 1.442695, %v1396_v56 }
 0x1a9   : > { %v1522_v18 = vmul.f32 1.442695, %v1338_v15  ;;  %v2130_v45 = vpop.f32.mrf.mxu0  ;;  %v2196_v1 = vpop.f32.mrf.mxu1 }
 0x1aa   : > { %v2131_v17 = vadd.f32 %v3913_v54, %v2130_v45  ;;  %v2197_v41 = vadd.f32 %v3913_v54, %v2196_v1  ;;  %v667_v20 = vpop.permute.xlu1 %666  ;;  %v4036_v1 = vpop.permute.xlu0 %816 }
 0x1ab   : > { %v1079_v59 = vsub.f32 %v667_v20, %v3714_v44  ;;  %3055 = vpow2.f32 %v1522_v18  ;;  %2760 = vmatmul.msk.f32.gmra.mxu2 %vm1674_vm0, %v3052_v5 }
 0x1ac   : > { %2478 = vst [vmem:[%s3631_s13 + $0x90] sm:$0xff] %v2131_v17  ;;  %3057 = vpow2.f32 %v1634_v60 }
 0x1ad   : > { %2500 = vst [vmem:[%s3631_s13 + $0x140] sm:$0xff] %v2197_v41  ;;  %v1211_v26 = vmul.f32 %v3721_v53, %v1079_v59  ;;  %2791 = vmatmul.msk.f32.gmra.mxu3 %vm1674_vm0, %v3054_v22  ;;  %3059 = vpow2.f32 %v1572_v7  ;;  %v4007_v53 = vld [vmem:[%s4407_s1] ss:$0 sm:$0xff]  ;;  %v4044_v41 = vpop.permute.xlu2 %821 }
 0x1ae   : > { %3061 = vpow2.f32 %v1574_v31  ;;  %v1137_v3 = vsub.f32 %v3964_v43, %v4007_v53  ;;  %v1106_v43 = vsub.f32 %v802_v10, %v4007_v53  ;;  %v1107_v18 = vsub.f32 %v3984_v9, %v4007_v53 }
 0x1af   : > { %v1339_v14 = vmul.f32 %v1211_v26, %v1079_v59  ;;  %v1138_v7 = vsub.f32 %v3917_v58, %v4007_v53 }
 0x1b1   : > { %v1524_v34 = vmul.f32 1.442695, %v1339_v14  ;;  %v2133_v46 = vpop.f32.mrf.mxu0  ;;  %v2199_v19 = vpop.f32.mrf.mxu1 }
 0x1b2   : > { %v3056_v13 = vpop.eup %3055  ;;  %v2134_v57 = vadd.f32 %v3913_v54, %v2133_v46  ;;  %v2200_v51 = vadd.f32 %v3913_v54, %v2199_v19  ;;  %v672_v33 = vpop.permute.xlu1 %671 }
 0x1b3   : > { %v3058_v55 = vpop.eup %3057  ;;  %v1080_v52 = vsub.f32 %v672_v33, %v3714_v44  ;;  %2736 = vmatmul.msk.f32.gmra.mxu1 %vm1674_vm0, %v3056_v13  ;;  %3063 = vpow2.f32 %v1524_v34  ;;  %v4017_v44 = vld [vmem:[%s4408_s2] ss:$0 sm:$0xff] }
 0x1b4   : > { %v3060_v2 = vpop.eup %3059  ;;  %2479 = vst [vmem:[%s3631_s13 + $0x98] sm:$0xff] %v2134_v57  ;;  %3065 = vpow2.f32 %v1636_v39  ;;  %v1269_v21 = vmul.f32 %v4017_v44, %v1137_v3  ;;  %v1238_v11 = vmul.f32 %v4017_v44, %v1106_v43  ;;  %v1239_v5 = vmul.f32 %v4017_v44, %v1107_v18 }
 0x1b5   : > { %2501 = vst [vmem:[%s3631_s13 + $0x148] sm:$0xff] %v2200_v51  ;;  %v1212_v24 = vmul.f32 %v4017_v44, %v1080_v52  ;;  %2761 = vmatmul.msk.f32.gmra.mxu2 %vm1674_vm0, %v3060_v2  ;;  %2792 = vmatmul.msk.f32.gmra.mxu3 %vm1674_vm0, %v3058_v55  ;;  %v2271_v40 = vpop.f32.mrf.mxu2  ;;  %v3062_v30 = vpop.eup %3061  ;;  %v1270_v58 = vmul.f32 %v4017_v44, %v1138_v7 }
 0x1b6   : > { %v2272_v0 = vadd.f32 %v3913_v54, %v2271_v40  ;;  %v2364_v25 = vpop.f32.mrf.mxu3  ;;  %v1397_v45 = vmul.f32 %v1269_v21, %v1137_v3  ;;  %v1366_v17 = vmul.f32 %v1238_v11, %v1106_v43  ;;  %v1367_v47 = vmul.f32 %v1239_v5, %v1107_v18 }
 0x1b7   : > { %v1340_v35 = vmul.f32 %v1212_v24, %v1080_v52  ;;  %v2365_v28 = vadd.f32 %v3913_v54, %v2364_v25  ;;  %v1108_v57 = vsub.f32 %v3937_v12, %v4007_v53  ;;  %v1398_v33 = vmul.f32 %v1270_v58, %v1138_v7  ;;  %v4065_v52 = vpop.permute.xlu0 %981 }
 0x1b8   : > { %2525 = vst [vmem:[%s3631_s13 + $0x208] sm:$0xff] %v2272_v0  ;;  %v1640_v59 = vmul.f32 1.442695, %v1397_v45  ;;  %v1578_v14 = vmul.f32 1.442695, %v1366_v17  ;;  %v1139_v55 = vsub.f32 %v3999_v50, %v4007_v53  ;;  %v1110_v58 = vsub.f32 %v4044_v41, %v4007_v53 }
 0x1b9   : > { %v1526_v4 = vmul.f32 1.442695, %v1340_v35  ;;  %v2136_v6 = vpop.f32.mrf.mxu0  ;;  %v2202_v8 = vpop.f32.mrf.mxu1  ;;  %2556 = vst [vmem:[%s3631_s13 + $0x300] sm:$0xff] %v2365_v28  ;;  %v1580_v3 = vmul.f32 1.442695, %v1367_v47  ;;  %v1240_v12 = vmul.f32 %v4017_v44, %v1108_v57 }
 0x1ba   : > { %v3064_v48 = vpop.eup %3063  ;;  %v2137_v42 = vadd.f32 %v3913_v54, %v2136_v6  ;;  %v2203_v62 = vadd.f32 %v3913_v54, %v2202_v8  ;;  %v677_v15 = vpop.permute.xlu1 %676  ;;  %v1642_v50 = vmul.f32 1.442695, %v1398_v33  ;;  %v1242_v41 = vmul.f32 %v4017_v44, %v1110_v58 }
 0x1bb   : > { %v1081_v10 = vsub.f32 %v677_v15, %v4007_v53  ;;  %2737 = vmatmul.msk.f32.gmra.mxu1 %vm1674_vm0, %v3064_v48  ;;  %v3066_v60 = vpop.eup %3065  ;;  %3067 = vpow2.f32 %v1526_v4  ;;  %v4073_v6 = vpop.permute.xlu2 %826  ;;  %v1368_v11 = vmul.f32 %v1240_v12, %v1108_v57  ;;  %v1109_v15 = vsub.f32 %v4036_v1, %v4007_v53 }
 0x1bc   : > { %2480 = vst [vmem:[%s3631_s13 + $0xa0] sm:$0xff] %v2137_v42  ;;  %3069 = vpow2.f32 %v1576_v49 }
 0x1bd   : > { %2502 = vst [vmem:[%s3631_s13 + $0x150] sm:$0xff] %v2203_v62  ;;  %v1213_v61 = vmul.f32 %v4017_v44, %v1081_v10  ;;  %2762 = vmatmul.msk.f32.gmra.mxu2 %vm1674_vm0, %v3062_v30  ;;  %2793 = vmatmul.msk.f32.gmra.mxu3 %vm1674_vm0, %v3066_v60  ;;  %3071 = vpow2.f32 %v1638_v32  ;;  %v1271_v30 = vmul.f32 %v4017_v44, %v1139_v55 }
 0x1be   : > { %v2274_v38 = vpop.f32.mrf.mxu2  ;;  %v1140_v32 = vsub.f32 %v4011_v16, %v4007_v53  ;;  %v1241_v1 = vmul.f32 %v4017_v44, %v1109_v15 }
 0x1bf   : > { %v1341_v20 = vmul.f32 %v1213_v61, %v1081_v10  ;;  %v2275_v23 = vadd.f32 %v3913_v54, %v2274_v38  ;;  %v1399_v62 = vmul.f32 %v1271_v30, %v1139_v55  ;;  %v1582_v61 = vmul.f32 1.442695, %v1368_v11 }
 0x1c0   : > { %v2367_v9 = vpop.f32.mrf.mxu3  ;;  %v1272_v60 = vmul.f32 %v4017_v44, %v1140_v32 }
 0x1c1   : > { %v1528_v22 = vmul.f32 1.442695, %v1341_v20  ;;  %v2368_v26 = vadd.f32 %v3913_v54, %v2367_v9  ;;  %v2139_v29 = vpop.f32.mrf.mxu0  ;;  %v2205_v37 = vpop.f32.mrf.mxu1  ;;  %2526 = vst [vmem:[%s3631_s13 + $0x210] sm:$0xff] %v2275_v23  ;;  %v1644_v9 = vmul.f32 1.442695, %v1399_v62 }
 0x1c2   : > { %v3068_v31 = vpop.eup %3067  ;;  %v2140_v36 = vadd.f32 %v3913_v54, %v2139_v29  ;;  %v2206_v34 = vadd.f32 %v3913_v54, %v2205_v37  ;;  %v682_v46 = vpop.permute.xlu1 %681 }
 0x1c3   : > { %v3070_v19 = vpop.eup %3069  ;;  %v1082_v13 = vsub.f32 %v682_v46, %v4007_v53  ;;  %2738 = vmatmul.msk.f32.gmra.mxu1 %vm1674_vm0, %v3068_v31  ;;  %3073 = vpow2.f32 %v1528_v22  ;;  %2557 = vst [vmem:[%s3631_s13 + $0x308] sm:$0xff] %v2368_v26  ;;  %v4094_v29 = vpop.permute.xlu0 %986  ;;  %v1141_v46 = vsub.f32 %v3954_v27, %v4007_v53 }
 0x1c4   : > { %v3072_v39 = vpop.eup %3071  ;;  %3075 = vpow2.f32 %v1640_v59  ;;  %2481 = vst [vmem:[%s3631_s13 + $0xa8] sm:$0xff] %v2140_v36  ;;  %v4102_v36 = vpop.permute.xlu2 %831 }
 0x1c5   : > { %v1214_v51 = vmul.f32 %v4017_v44, %v1082_v13  ;;  %2763 = vmatmul.msk.f32.gmra.mxu2 %vm1674_vm0, %v3070_v19  ;;  %2794 = vmatmul.msk.f32.gmra.mxu3 %vm1674_vm0, %v3072_v39  ;;  %3077 = vpow2.f32 %v1578_v14  ;;  %2503 = vst [vmem:[%s3631_s13 + $0x158] sm:$0xff] %v2206_v34  ;;  %v1400_v14 = vmul.f32 %v1272_v60, %v1140_v32 }
 0x1c6   : > { %v2277_v63 = vpop.f32.mrf.mxu2  ;;  %v1369_v19 = vmul.f32 %v1241_v1, %v1109_v15  ;;  %v1273_v27 = vmul.f32 %v4017_v44, %v1141_v46 }
 0x1c7   : > { %v1342_v2 = vmul.f32 %v1214_v51, %v1082_v13  ;;  %v2278_v43 = vadd.f32 %v3913_v54, %v2277_v63  ;;  %v1646_v51 = vmul.f32 1.442695, %v1400_v14 }
 0x1c8   : > { %v2370_v24 = vpop.f32.mrf.mxu3 }
 0x1c9   : > { %v1530_v56 = vmul.f32 1.442695, %v1342_v2  ;;  %v2371_v40 = vadd.f32 %v3913_v54, %v2370_v24  ;;  %v2142_v35 = vpop.f32.mrf.mxu0  ;;  %v2208_v0 = vpop.f32.mrf.mxu1  ;;  %2527 = vst [vmem:[%s3631_s13 + $0x218] sm:$0xff] %v2278_v43  ;;  %v1584_v24 = vmul.f32 1.442695, %v1369_v19 }
 0x1ca   : > { %v3074_v25 = vpop.eup %3073  ;;  %v2143_v21 = vadd.f32 %v3913_v54, %v2142_v35  ;;  %v2209_v49 = vadd.f32 %v3913_v54, %v2208_v0  ;;  %v687_v4 = vpop.permute.xlu1 %686 }
 0x1cb   : > { %v3076_v28 = vpop.eup %3075  ;;  %3079 = vpow2.f32 %v1530_v56  ;;  %v1083_v8 = vsub.f32 %v687_v4, %v4007_v53  ;;  %2739 = vmatmul.msk.f32.gmra.mxu1 %vm1674_vm0, %v3074_v25  ;;  %2558 = vst [vmem:[%s3631_s13 + $0x310] sm:$0xff] %v2371_v40  ;;  %v1370_v25 = vmul.f32 %v1242_v41, %v1110_v58  ;;  %v4123_v30 = vpop.permute.xlu0 %991  ;;  %v1142_v4 = vsub.f32 %v4065_v52, %v4007_v53 }
 0x1cc   : > { %v3078_v48 = vpop.eup %3077  ;;  %3081 = vpow2.f32 %v1580_v3  ;;  %2482 = vst [vmem:[%s3631_s13 + $0xb0] sm:$0xff] %v2143_v21 }
 0x1cd   : > { %v1215_v42 = vmul.f32 %v4017_v44, %v1083_v8  ;;  %2764 = vmatmul.msk.f32.gmra.mxu2 %vm1674_vm0, %v3078_v48  ;;  %2795 = vmatmul.msk.f32.gmra.mxu3 %vm1674_vm0, %v3076_v28  ;;  %3083 = vpow2.f32 %v1642_v50  ;;  %2504 = vst [vmem:[%s3631_s13 + $0x160] sm:$0xff] %v2209_v49  ;;  %v1111_v50 = vsub.f32 %v4073_v6, %v4007_v53  ;;  %v837_v28 = vpop.permute.xlu2 %836  ;;  %v1586_v48 = vmul.f32 1.442695, %v1370_v25 }
 0x1ce   : > { %v2280_v16 = vpop.f32.mrf.mxu2  ;;  %v1401_v49 = vmul.f32 %v1273_v27, %v1141_v46 }
 0x1cf   : > { %v1343_v10 = vmul.f32 %v1215_v42, %v1083_v8  ;;  %v2281_v17 = vadd.f32 %v3913_v54, %v2280_v16  ;;  %v1243_v42 = vmul.f32 %v4017_v44, %v1111_v50 }
 0x1d0   : > { %v2373_v18 = vpop.f32.mrf.mxu3  ;;  %v1648_v52 = vmul.f32 1.442695, %v1401_v49 }
 0x1d1   : > { %v3080_v45 = vpop.eup %3079  ;;  %v1532_v7 = vmul.f32 1.442695, %v1343_v10  ;;  %v2374_v20 = vadd.f32 %v3913_v54, %v2373_v18  ;;  %v2145_v5 = vpop.f32.mrf.mxu0  ;;  %2528 = vst [vmem:[%s3631_s13 + $0x220] sm:$0xff] %v2281_v17  ;;  %v1274_v18 = vmul.f32 %v4017_v44, %v1142_v4 }
 0x1d2   : > { %v2211_v38 = vpop.f32.mrf.mxu1  ;;  %v2146_v59 = vadd.f32 %v3913_v54, %v2145_v5  ;;  %v692_v23 = vpop.permute.xlu1 %691  ;;  %v1112_v5 = vsub.f32 %v4102_v36, %v4007_v53 }
 0x1d3   : > { %v2212_v22 = vadd.f32 %v3913_v54, %v2211_v38  ;;  %v3082_v26 = vpop.eup %3081  ;;  %3085 = vpow2.f32 %v1532_v7  ;;  %v1084_v37 = vsub.f32 %v692_v23, %v4007_v53  ;;  %2740 = vmatmul.msk.f32.gmra.mxu1 %vm1674_vm0, %v3080_v45  ;;  %2559 = vst [vmem:[%s3631_s13 + $0x318] sm:$0xff] %v2374_v20  ;;  %v1371_v20 = vmul.f32 %v1243_v42, %v1111_v50  ;;  %v997_v1 = vpop.permute.xlu0 %996 }
 0x1d4   : > { %v3084_v31 = vpop.eup %3083  ;;  %3087 = vpow2.f32 %v1582_v61  ;;  %2483 = vst [vmem:[%s3631_s13 + $0xb8] sm:$0xff] %v2146_v59  ;;  %v1402_v38 = vmul.f32 %v1274_v18, %v1142_v4 }
 0x1d5   : > { %v1216_v34 = vmul.f32 %v4017_v44, %v1084_v37  ;;  %2765 = vmatmul.msk.f32.gmra.mxu2 %vm1674_vm0, %v3082_v26  ;;  %2796 = vmatmul.msk.f32.gmra.mxu3 %vm1674_vm0, %v3084_v31  ;;  %3089 = vpow2.f32 %v1644_v9  ;;  %2505 = vst [vmem:[%s3631_s13 + $0x168] sm:$0xff] %v2212_v22  ;;  %v1143_v9 = vsub.f32 %v4094_v29, %v4007_v53  ;;  %v1588_v26 = vmul.f32 1.442695, %v1371_v20  ;;  %v842_v41 = vpop.permute.xlu2 %841 }
 0x1d6   : > { %v2283_v39 = vpop.f32.mrf.mxu2  ;;  %v1114_v49 = vsub.f32 %v842_v41, %v4007_v53 }
 0x1d7   : > { %v1344_v13 = vmul.f32 %v1216_v34, %v1084_v37  ;;  %v2284_v55 = vadd.f32 %v3913_v54, %v2283_v39  ;;  %v1244_v37 = vmul.f32 %v4017_v44, %v1112_v5  ;;  %v1650_v34 = vmul.f32 1.442695, %v1402_v38 }
 0x1d8   : > { %v2376_v47 = vpop.f32.mrf.mxu3  ;;  %v1275_v29 = vmul.f32 %v4017_v44, %v1143_v9 }
 0x1d9   : > { %v3086_v57 = vpop.eup %3085  ;;  %v1534_v33 = vmul.f32 1.442695, %v1344_v13  ;;  %v2377_v2 = vadd.f32 %v3913_v54, %v2376_v47  ;;  %v2148_v3 = vpop.f32.mrf.mxu0  ;;  %2529 = vst [vmem:[%s3631_s13 + $0x228] sm:$0xff] %v2284_v55  ;;  %v1372_v47 = vmul.f32 %v1244_v37, %v1112_v5 }
 0x1da   : > { %v2214_v63 = vpop.f32.mrf.mxu1  ;;  %v2149_v12 = vadd.f32 %v3913_v54, %v2148_v3  ;;  %v697_v43 = vpop.permute.xlu1 %696 }
 0x1db   : > { %v2215_v56 = vadd.f32 %v3913_v54, %v2214_v63  ;;  %v3088_v40 = vpop.eup %3087  ;;  %3091 = vpow2.f32 %v1534_v33  ;;  %v1085_v35 = vsub.f32 %v697_v43, %v4007_v53  ;;  %2741 = vmatmul.msk.f32.gmra.mxu1 %vm1674_vm0, %v3086_v57  ;;  %2560 = vst [vmem:[%s3631_s13 + $0x320] sm:$0xff] %v2377_v2  ;;  %v1113_v57 = vsub.f32 %v837_v28, %v4007_v53  ;;  %v1002_v50 = vpop.permute.xlu0 %1001 }
 0x1dc   : > { %v3090_v0 = vpop.eup %3089  ;;  %3093 = vpow2.f32 %v1646_v51  ;;  %2484 = vst [vmem:[%s3631_s13 + $0xc0] sm:$0xff] %v2149_v12  ;;  %v1403_v51 = vmul.f32 %v1275_v29, %v1143_v9  ;;  %v1144_v33 = vsub.f32 %v4123_v30, %v4007_v53  ;;  %v1590_v3 = vmul.f32 1.442695, %v1372_v47 }
 0x1dd   : > { %v1217_v21 = vmul.f32 %v4017_v44, %v1085_v35  ;;  %2766 = vmatmul.msk.f32.gmra.mxu2 %vm1674_vm0, %v3088_v40  ;;  %2797 = vmatmul.msk.f32.gmra.mxu3 %vm1674_vm0, %v3090_v0  ;;  %3095 = vpow2.f32 %v1584_v24  ;;  %2506 = vst [vmem:[%s3631_s13 + $0x170] sm:$0xff] %v2215_v56  ;;  %v1245_v63 = vmul.f32 %v4017_v44, %v1113_v57  ;;  %v847_v4 = vpop.permute.xlu2 %846 }
 0x1de   : > { %v2286_v6 = vpop.f32.mrf.mxu2  ;;  %v1652_v43 = vmul.f32 1.442695, %v1403_v51  ;;  %v1276_v40 = vmul.f32 %v4017_v44, %v1144_v33  ;;  %v1146_v38 = vsub.f32 %v1002_v50, %v4007_v53 }
 0x1df   : > { %v1345_v8 = vmul.f32 %v1217_v21, %v1085_v35  ;;  %v2287_v15 = vadd.f32 %v3913_v54, %v2286_v6  ;;  %v1373_v21 = vmul.f32 %v1245_v63, %v1113_v57 }
 0x1e0   : > { %v2379_v32 = vpop.f32.mrf.mxu3  ;;  %v1404_v28 = vmul.f32 %v1276_v40, %v1144_v33 }
 0x1e1   : > { %v3092_v11 = vpop.eup %3091  ;;  %v1536_v62 = vmul.f32 1.442695, %v1345_v8  ;;  %v2380_v10 = vadd.f32 %v3913_v54, %v2379_v32  ;;  %v2151_v60 = vpop.f32.mrf.mxu0  ;;  %2530 = vst [vmem:[%s3631_s13 + $0x230] sm:$0xff] %v2287_v15  ;;  %v1145_v8 = vsub.f32 %v997_v1, %v4007_v53  ;;  %v1592_v32 = vmul.f32 1.442695, %v1373_v21 }
 0x1e2   : > { %v2217_v16 = vpop.f32.mrf.mxu1  ;;  %v2152_v45 = vadd.f32 %v3913_v54, %v2151_v60  ;;  %v3094_v7 = vpop.eup %3093  ;;  %v1654_v60 = vmul.f32 1.442695, %v1404_v28 }
 0x1e3   : > { %v2218_v61 = vadd.f32 %v3913_v54, %v2217_v16  ;;  %3097 = vpow2.f32 %v1536_v62  ;;  %2742 = vmatmul.msk.f32.gmra.mxu1 %vm1674_vm0, %v3092_v11  ;;  %v3096_v17 = vpop.eup %3095  ;;  %2561 = vst [vmem:[%s3631_s13 + $0x328] sm:$0xff] %v2380_v10  ;;  %v1246_v11 = vmul.f32 %v4017_v44, %v1114_v49  ;;  %v1277_v16 = vmul.f32 %v4017_v44, %v1145_v8  ;;  %v1007_v20 = vpop.permute.xlu0 %1006 }
 0x1e4   : > { %3099 = vpow2.f32 %v1586_v48  ;;  %2485 = vst [vmem:[%s3631_s13 + $0xc8] sm:$0xff] %v2152_v45  ;;  %v1147_v47 = vsub.f32 %v1007_v20, %v4007_v53 }
 0x1e5   : > { %2767 = vmatmul.msk.f32.gmra.mxu2 %vm1674_vm0, %v3096_v17  ;;  %2798 = vmatmul.msk.f32.gmra.mxu3 %vm1674_vm0, %v3094_v7  ;;  %3101 = vpow2.f32 %v1648_v52  ;;  %2507 = vst [vmem:[%s3631_s13 + $0x178] sm:$0xff] %v2218_v61  ;;  %v1374_v7 = vmul.f32 %v1246_v11, %v1114_v49  ;;  %v1115_v17 = vsub.f32 %v847_v4, %v4007_v53  ;;  %v852_v9 = vpop.permute.xlu2 %851 }
 0x1e6   : > { %v2289_v59 = vpop.f32.mrf.mxu2  ;;  %3103 = vpow2.f32 %v1588_v26  ;;  %v1405_v5 = vmul.f32 %v1277_v16, %v1145_v8  ;;  %v1116_v41 = vsub.f32 %v852_v9, %v4007_v53 }
 0x1e7   : > { %v2290_v31 = vadd.f32 %v3913_v54, %v2289_v59  ;;  %3105 = vpow2.f32 %v1650_v34 }
 0x1e8   : > { %v2382_v22 = vpop.f32.mrf.mxu3  ;;  %3107 = vpow2.f32 %v1590_v3 }
 0x1e9   : > { %v3098_v23 = vpop.eup %3097  ;;  %v2383_v58 = vadd.f32 %v3913_v54, %v2382_v22  ;;  %v2154_v14 = vpop.f32.mrf.mxu0  ;;  %2531 = vst [vmem:[%s3631_s13 + $0x238] sm:$0xff] %v2290_v31  ;;  %3109 = vpow2.f32 %v1652_v43  ;;  %v1594_v22 = vmul.f32 1.442695, %v1374_v7  ;;  %v1279_v43 = vmul.f32 %v4017_v44, %v1147_v47 }
 0x1ea   : > { %v2220_v36 = vpop.f32.mrf.mxu1  ;;  %v2155_v46 = vadd.f32 %v3913_v54, %v2154_v14  ;;  %v3100_v13 = vpop.eup %3099  ;;  %3111 = vpow2.f32 %v1592_v32  ;;  %v1656_v14 = vmul.f32 1.442695, %v1405_v5 }
 0x1eb   : > { %v2221_v19 = vadd.f32 %v3913_v54, %v2220_v36  ;;  %2743 = vmatmul.msk.f32.gmra.mxu1 %vm1674_vm0, %v3098_v23  ;;  %v3102_v39 = vpop.eup %3101  ;;  %2562 = vst [vmem:[%s3631_s13 + $0x330] sm:$0xff] %v2383_v58  ;;  %3113 = vpow2.f32 %v1654_v60  ;;  %v1247_v23 = vmul.f32 %v4017_v44, %v1115_v17  ;;  %v1278_v36 = vmul.f32 %v4017_v44, %v1146_v38  ;;  %v1012_v57 = vpop.permute.xlu0 %1011 }
 0x1ec   : > { %2486 = vst [vmem:[%s3631_s13 + $0xd0] sm:$0xff] %v2155_v46  ;;  %v3104_v25 = vpop.eup %3103  ;;  %3115 = vpow2.f32 %v1594_v22  ;;  %v1407_v21 = vmul.f32 %v1279_v43, %v1147_v47  ;;  %v1148_v49 = vsub.f32 %v1012_v57, %v4007_v53 }
 0x1ed   : > { %2768 = vmatmul.msk.f32.gmra.mxu2 %vm1674_vm0, %v3100_v13  ;;  %2799 = vmatmul.msk.f32.gmra.mxu3 %vm1674_vm0, %v3102_v39  ;;  %2508 = vst [vmem:[%s3631_s13 + $0x180] sm:$0xff] %v2221_v19  ;;  %v3106_v30 = vpop.eup %3105  ;;  %v1375_v13 = vmul.f32 %v1247_v23, %v1115_v17  ;;  %3117 = vpow2.f32 %v1656_v14  ;;  %v1406_v39 = vmul.f32 %v1278_v36, %v1146_v38 }
 0x1ee   : > { %v2292_v55 = vpop.f32.mrf.mxu2  ;;  %v3108_v45 = vpop.eup %3107 }
 0x1ef   : > { %v2293_v27 = vadd.f32 %v3913_v54, %v2292_v55  ;;  %v3110_v61 = vpop.eup %3109  ;;  %v1596_v55 = vmul.f32 1.442695, %v1375_v13 }
 0x1f0   : > { %v2385_v2 = vpop.f32.mrf.mxu3  ;;  %v3112_v46 = vpop.eup %3111 }
 0x1f1   : > { %v2386_v24 = vadd.f32 %v3913_v54, %v2385_v2  ;;  %v2157_v12 = vpop.f32.mrf.mxu0  ;;  %2532 = vst [vmem:[%s3631_s13 + $0x240] sm:$0xff] %v2293_v27  ;;  %v3114_v19 = vpop.eup %3113  ;;  %v1248_v2 = vmul.f32 %v4017_v44, %v1116_v41  ;;  %3119 = vpow2.f32 %v1596_v55 }
 0x1f2   : > { %v2223_v56 = vpop.f32.mrf.mxu1  ;;  %v2158_v35 = vadd.f32 %v3913_v54, %v2157_v12  ;;  %v857_v12 = vpop.permute.xlu2 %856 }
 0x1f3   : > { %v2224_v0 = vadd.f32 %v3913_v54, %v2223_v56  ;;  %2563 = vst [vmem:[%s3631_s13 + $0x338] sm:$0xff] %v2386_v24  ;;  %v1658_v56 = vmul.f32 1.442695, %v1406_v39  ;;  %v1376_v50 = vmul.f32 %v1248_v2, %v1116_v41 }
 0x1f4   : > { %2487 = vst [vmem:[%s3631_s13 + $0xd8] sm:$0xff] %v2158_v35 }
 0x1f5   : > { %2769 = vmatmul.msk.f32.gmra.mxu2 %vm1674_vm0, %v3104_v25  ;;  %2800 = vmatmul.msk.f32.gmra.mxu3 %vm1674_vm0, %v3106_v30  ;;  %2509 = vst [vmem:[%s3631_s13 + $0x188] sm:$0xff] %v2224_v0  ;;  %v3116_v0 = vpop.eup %3115  ;;  %v1117_v30 = vsub.f32 %v857_v12, %v4007_v53  ;;  %3121 = vpow2.f32 %v1658_v56  ;;  %v1598_v28 = vmul.f32 1.442695, %v1376_v50 }
 0x1f6   : > { %v2295_v48 = vpop.f32.mrf.mxu2  ;;  %v3118_v25 = vpop.eup %3117 }
 0x1f7   : > { %v2296_v42 = vadd.f32 %v3913_v54, %v2295_v48  ;;  %v1249_v8 = vmul.f32 %v4017_v44, %v1117_v30  ;;  %v4225_v48 = vld [vmem:[%s4410_s4] ss:$0 sm:$0xff]  ;;  %v3120_v16 = vpop.eup %3119  ;;  %3123 = vpow2.f32 %v1598_v28 }
 0x1f8   : > { %v2388_v6 = vpop.f32.mrf.mxu3 }
 0x1f9   : > { %v2389_v62 = vadd.f32 %v3913_v54, %v2388_v6  ;;  %v2160_v15 = vpop.f32.mrf.mxu0  ;;  %2533 = vst [vmem:[%s3631_s13 + $0x248] sm:$0xff] %v2296_v42 }
 0x1fa   : > { %v2226_v10 = vpop.f32.mrf.mxu1  ;;  %v2161_v52 = vadd.f32 %v3913_v54, %v2160_v15  ;;  %v1280_v15 = vmul.f32 %v4017_v44, %v1148_v49 }
 0x1fb   : > { %v2227_v18 = vadd.f32 %v3913_v54, %v2226_v10  ;;  %2564 = vst [vmem:[%s3631_s13 + $0x340] sm:$0xff] %v2389_v62  ;;  %v1660_v62 = vmul.f32 1.442695, %v1407_v21 }
 0x1fc   : > { %2488 = vst [vmem:[%s3631_s13 + $0xe0] sm:$0xff] %v2161_v52  ;;  %v1017_v52 = vpop.permute.xlu0 %1016 }
 0x1fd   : > { %2770 = vmatmul.msk.f32.gmra.mxu2 %vm1674_vm0, %v3108_v45  ;;  %2801 = vmatmul.msk.f32.gmra.mxu3 %vm1674_vm0, %v3110_v61  ;;  %2510 = vst [vmem:[%s3631_s13 + $0x190] sm:$0xff] %v2227_v18  ;;  %v3122_v18 = vpop.eup %3121  ;;  %v1377_v45 = vmul.f32 %v1249_v8, %v1117_v30  ;;  %3125 = vpow2.f32 %v1660_v62  ;;  %v1408_v61 = vmul.f32 %v1280_v15, %v1148_v49 }
 0x1fe   : > { %v2298_v1 = vpop.f32.mrf.mxu2  ;;  %v1149_v7 = vsub.f32 %v1017_v52, %v4007_v53 }
 0x1ff   : > { %v2299_v26 = vadd.f32 %v3913_v54, %v2298_v1  ;;  %v1600_v5 = vmul.f32 1.442695, %v1377_v45 }
 0x200   : > { %v2391_v59 = vpop.f32.mrf.mxu3  ;;  %v1281_v22 = vmul.f32 %v4017_v44, %v1149_v7 }
 0x201   : > { %v2392_v37 = vadd.f32 %v3913_v54, %v2391_v59  ;;  %v2163_v31 = vpop.f32.mrf.mxu0  ;;  %2534 = vst [vmem:[%s3631_s13 + $0x250] sm:$0xff] %v2299_v26  ;;  %v1662_v59 = vmul.f32 1.442695, %v1408_v61  ;;  %v3124_v26 = vpop.eup %3123  ;;  %3127 = vpow2.f32 %v1600_v5 }
 0x202   : > { %v2229_v58 = vpop.f32.mrf.mxu1  ;;  %v2164_v34 = vadd.f32 %v3913_v54, %v2163_v31  ;;  %v1409_v53 = vmul.f32 %v1281_v22, %v1149_v7 }
 0x203   : > { %v2230_v29 = vadd.f32 %v3913_v54, %v2229_v58  ;;  %2565 = vst [vmem:[%s3631_s13 + $0x348] sm:$0xff] %v2392_v37  ;;  %v3126_v37 = vpop.eup %3125  ;;  %3129 = vpow2.f32 %v1662_v59 }
 0x204   : > { %2489 = vst [vmem:[%s3631_s13 + $0xe8] sm:$0xff] %v2164_v34  ;;  %v1664_v34 = vmul.f32 1.442695, %v1409_v53 }
 0x205   : > { %2771 = vmatmul.msk.f32.gmra.mxu2 %vm1674_vm0, %v3112_v46  ;;  %2802 = vmatmul.msk.f32.gmra.mxu3 %vm1674_vm0, %v3114_v19  ;;  %2511 = vst [vmem:[%s3631_s13 + $0x198] sm:$0xff] %v2230_v29 }
 0x206   : > { %v2301_v51 = vpop.f32.mrf.mxu2  ;;  %3131 = vpow2.f32 %v1664_v34 }
 0x207   : > { %v2302_v3 = vadd.f32 %v3913_v54, %v2301_v51  ;;  %v3128_v46 = vpop.eup %3127 }
 0x208   : > { %v2394_v33 = vpop.f32.mrf.mxu3 }
 0x209   : > { %v2395_v63 = vadd.f32 %v3913_v54, %v2394_v33  ;;  %v2166_v27 = vpop.f32.mrf.mxu0  ;;  %2535 = vst [vmem:[%s3631_s13 + $0x258] sm:$0xff] %v2302_v3  ;;  %v3130_v19 = vpop.eup %3129 }
 0x20a   : > { %v2232_v24 = vpop.f32.mrf.mxu1  ;;  %v2167_v40 = vadd.f32 %v3913_v54, %v2166_v27 }
 0x20b   : > { %v2233_v35 = vadd.f32 %v3913_v54, %v2232_v24  ;;  %2566 = vst [vmem:[%s3631_s13 + $0x350] sm:$0xff] %v2395_v63 }
 0x20c   : > { %2490 = vst [vmem:[%s3631_s13 + $0xf0] sm:$0xff] %v2167_v40  ;;  %v3132_v57 = vpop.eup %3131 }
 0x20d   : > { %2772 = vmatmul.msk.f32.gmra.mxu2 %vm1674_vm0, %v3116_v0  ;;  %2803 = vmatmul.msk.f32.gmra.mxu3 %vm1674_vm0, %v3118_v25  ;;  %2512 = vst [vmem:[%s3631_s13 + $0x1a0] sm:$0xff] %v2233_v35 }
 0x20e   : > { %v2304_v54 = vpop.f32.mrf.mxu2 }
 0x20f   : > { %v2305_v6 = vadd.f32 %v4225_v48, %v2304_v54 }
 0x210   : > { %v2397_v4 = vpop.f32.mrf.mxu3 }
 0x211   : > { %v2398_v32 = vadd.f32 %v4225_v48, %v2397_v4  ;;  %v2169_v11 = vpop.f32.mrf.mxu0  ;;  %2536 = vst [vmem:[%s3631_s13 + $0x260] sm:$0xff] %v2305_v6 }
 0x212   : > { %v2235_v42 = vpop.f32.mrf.mxu1  ;;  %v2170_v10 = vadd.f32 %v4225_v48, %v2169_v11 }
 0x213   : > { %v2236_v60 = vadd.f32 %v4225_v48, %v2235_v42  ;;  %2567 = vst [vmem:[%s3631_s13 + $0x358] sm:$0xff] %v2398_v32 }
 0x214   : > { %2491 = vst [vmem:[%s3631_s13 + $0xf8] sm:$0xff] %v2170_v10 }
 0x215   : > { %2773 = vmatmul.msk.f32.gmra.mxu2 %vm1674_vm0, %v3120_v16  ;;  %2804 = vmatmul.msk.f32.gmra.mxu3 %vm1674_vm0, %v3122_v18  ;;  %2513 = vst [vmem:[%s3631_s13 + $0x1a8] sm:$0xff] %v2236_v60 }
 0x216   : > { %v2307_v17 = vpop.f32.mrf.mxu2 }
 0x217   : > { %v2308_v38 = vadd.f32 %v4225_v48, %v2307_v17 }
 0x218   : > { %v2400_v20 = vpop.f32.mrf.mxu3 }
 0x219   : > { %v2401_v9 = vadd.f32 %v4225_v48, %v2400_v20  ;;  %2537 = vst [vmem:[%s3631_s13 + $0x268] sm:$0xff] %v2308_v38 }
 0x21a   : > { %v2238_v1 = vpop.f32.mrf.mxu1 }
 0x21b   : > { %v2239_v23 = vadd.f32 %v4225_v48, %v2238_v1  ;;  %2568 = vst [vmem:[%s3631_s13 + $0x360] sm:$0xff] %v2401_v9 }
 0x21d   : > { %2514 = vst [vmem:[%s3631_s13 + $0x1b0] sm:$0xff] %v2239_v23  ;;  %2774 = vmatmul.msk.f32.gmra.mxu2 %vm1674_vm0, %v3124_v26  ;;  %2805 = vmatmul.msk.f32.gmra.mxu3 %vm1674_vm0, %v3126_v37 }
 0x21e   : > { %v2310_v31 = vpop.f32.mrf.mxu2 }
 0x21f   : > { %v2311_v44 = vadd.f32 %v4225_v48, %v2310_v31 }
 0x220   : > { %v2403_v58 = vpop.f32.mrf.mxu3 }
 0x221   : > { %v2404_v14 = vadd.f32 %v4225_v48, %v2403_v58  ;;  %2538 = vst [vmem:[%s3631_s13 + $0x270] sm:$0xff] %v2311_v44 }
 0x222   : > { %v2241_v36 = vpop.f32.mrf.mxu1 }
 0x223   : > { %v2242_v29 = vadd.f32 %v4225_v48, %v2241_v36  ;;  %2569 = vst [vmem:[%s3631_s13 + $0x368] sm:$0xff] %v2404_v14 }
 0x225   : > { %2515 = vst [vmem:[%s3631_s13 + $0x1b8] sm:$0xff] %v2242_v29  ;;  %2775 = vmatmul.msk.f32.gmra.mxu2 %vm1674_vm0, %v3128_v46  ;;  %2806 = vmatmul.msk.f32.gmra.mxu3 %vm1674_vm0, %v3130_v19 }
 0x226   : > { %v2313_v13 = vpop.f32.mrf.mxu2 }
 0x227   : > { %v2314_v39 = vadd.f32 %v4225_v48, %v2313_v13 }
 0x228   : > { %v2406_v41 = vpop.f32.mrf.mxu3 }
 0x229   : > { %v2407_v47 = vadd.f32 %v4225_v48, %v2406_v41  ;;  %2539 = vst [vmem:[%s3631_s13 + $0x278] sm:$0xff] %v2314_v39 }
 0x22b   : > { %2570 = vst [vmem:[%s3631_s13 + $0x370] sm:$0xff] %v2407_v47 }
 0x22d   : > { %2807 = vmatmul.msk.f32.gmra.mxu3 %vm1674_vm0, %v3132_v57 }
 0x22e   : > { %v2316_v51 = vpop.f32.mrf.mxu2 }
 0x22f   : > { %v2317_v55 = vadd.f32 %v4225_v48, %v2316_v51 }
 0x230   : > { %v2409_v33 = vpop.f32.mrf.mxu3  ;;  %v2244_v3 = vpop.f32.mrf.mxu1 }
 0x231   : > { %v2410_v2 = vadd.f32 %v4225_v48, %v2409_v33  ;;  %v2245_v63 = vadd.f32 %v4225_v48, %v2244_v3  ;;  %2540 = vst [vmem:[%s3631_s13 + $0x280] sm:$0xff] %v2317_v55 }
 0x233   : > { %2571 = vst [vmem:[%s3631_s13 + $0x378] sm:$0xff] %v2410_v2 }
 0x234   : > { %2516 = vst [vmem:[%s3631_s13 + $0x1c0] sm:$0xff] %v2245_v63 }
 0x238   : > { %v2319_v27 = vpop.f32.mrf.mxu2  ;;  %v2412_v24 = vpop.f32.mrf.mxu3 }
 0x239   : > { %v2320_v12 = vadd.f32 %v4225_v48, %v2319_v27  ;;  %v2413_v56 = vadd.f32 %v4225_v48, %v2412_v24  ;;  %v2247_v43 = vpop.f32.mrf.mxu1 }
 0x23a   : > { %v2248_v40 = vadd.f32 %v4225_v48, %v2247_v43 }
 0x23b   : > { %2541 = vst [vmem:[%s3631_s13 + $0x288] sm:$0xff] %v2320_v12 }
 0x23c   : > { %2572 = vst [vmem:[%s3631_s13 + $0x380] sm:$0xff] %v2413_v56 }
 0x23d   : > { %2517 = vst [vmem:[%s3631_s13 + $0x1c8] sm:$0xff] %v2248_v40 }
 0x240   : > { %v2322_v35 = vpop.f32.mrf.mxu2  ;;  %v2415_v0 = vpop.f32.mrf.mxu3 }
 0x241   : > { %v2323_v25 = vadd.f32 %v4225_v48, %v2322_v35  ;;  %v2416_v50 = vadd.f32 %v4225_v48, %v2415_v0  ;;  %v2250_v30 = vpop.f32.mrf.mxu1 }
 0x242   : > { %v2251_v21 = vadd.f32 %v4225_v48, %v2250_v30 }
 0x243   : > { %2542 = vst [vmem:[%s3631_s13 + $0x290] sm:$0xff] %v2323_v25 }
 0x244   : > { %2573 = vst [vmem:[%s3631_s13 + $0x388] sm:$0xff] %v2416_v50 }
 0x245   : > { %2518 = vst [vmem:[%s3631_s13 + $0x1d0] sm:$0xff] %v2251_v21 }
 0x248   : > { %v2325_v49 = vpop.f32.mrf.mxu2  ;;  %v2418_v54 = vpop.f32.mrf.mxu3 }
 0x249   : > { %v2326_v4 = vadd.f32 %v4225_v48, %v2325_v49  ;;  %v2419_v28 = vadd.f32 %v4225_v48, %v2418_v54  ;;  %v2253_v8 = vpop.f32.mrf.mxu1 }
 0x24a   : > { %v2254_v6 = vadd.f32 %v4225_v48, %v2253_v8 }
 0x24b   : > { %2543 = vst [vmem:[%s3631_s13 + $0x298] sm:$0xff] %v2326_v4 }
 0x24c   : > { %2574 = vst [vmem:[%s3631_s13 + $0x390] sm:$0xff] %v2419_v28 }
 0x24d   : > { %2519 = vst [vmem:[%s3631_s13 + $0x1d8] sm:$0xff] %v2254_v6 }
 0x250   : > { %v2328_v32 = vpop.f32.mrf.mxu2  ;;  %v2421_v11 = vpop.f32.mrf.mxu3 }
 0x251   : > { %v2329_v42 = vadd.f32 %v4225_v48, %v2328_v32  ;;  %v2422_v62 = vadd.f32 %v4225_v48, %v2421_v11  ;;  %v2256_v15 = vpop.f32.mrf.mxu1 }
 0x252   : > { %v2257_v10 = vadd.f32 %v4225_v48, %v2256_v15 }
 0x253   : > { %2544 = vst [vmem:[%s3631_s13 + $0x2a0] sm:$0xff] %v2329_v42 }
 0x254   : > { %2575 = vst [vmem:[%s3631_s13 + $0x398] sm:$0xff] %v2422_v62 }
 0x255   : > { %2520 = vst [vmem:[%s3631_s13 + $0x1e0] sm:$0xff] %v2257_v10 }
 0x258   : > { %v2331_v60 = vpop.f32.mrf.mxu2  ;;  %v2424_v16 = vpop.f32.mrf.mxu3 }
 0x259   : > { %v2332_v52 = vadd.f32 %v4225_v48, %v2331_v60  ;;  %v2425_v18 = vadd.f32 %v4225_v48, %v2424_v16  ;;  %v2259_v45 = vpop.f32.mrf.mxu1 }
 0x25a   : > { %v2260_v61 = vadd.f32 %v4225_v48, %v2259_v45 }
 0x25b   : > { %2545 = vst [vmem:[%s3631_s13 + $0x2a8] sm:$0xff] %v2332_v52 }
 0x25c   : > { %2576 = vst [vmem:[%s3631_s13 + $0x3a0] sm:$0xff] %v2425_v18 }
 0x25d   : > { %2521 = vst [vmem:[%s3631_s13 + $0x1e8] sm:$0xff] %v2260_v61 }
 0x260   : > { %v2334_v7 = vpop.f32.mrf.mxu2  ;;  %v2427_v17 = vpop.f32.mrf.mxu3 }
 0x261   : > { %v2335_v20 = vadd.f32 %v4225_v48, %v2334_v7  ;;  %v2428_v5 = vadd.f32 %v4225_v48, %v2427_v17  ;;  %v2262_v38 = vpop.f32.mrf.mxu1 }
 0x262   : > { %v2263_v9 = vadd.f32 %v4225_v48, %v2262_v38 }
 0x263   : > { %2546 = vst [vmem:[%s3631_s13 + $0x2b0] sm:$0xff] %v2335_v20 }
 0x264   : > { %2577 = vst [vmem:[%s3631_s13 + $0x3a8] sm:$0xff] %v2428_v5 }
 0x265   : > { %2522 = vst [vmem:[%s3631_s13 + $0x1f0] sm:$0xff] %v2263_v9 }
 0x268   : > { %v2337_v1 = vpop.f32.mrf.mxu2  ;;  %v2430_v59 = vpop.f32.mrf.mxu3 }
 0x269   : > { %v2338_v22 = vadd.f32 %v4225_v48, %v2337_v1  ;;  %v2431_v23 = vadd.f32 %v4225_v48, %v2430_v59  ;;  %v2265_v26 = vpop.f32.mrf.mxu1 }
 0x26a   : > { %v2266_v37 = vadd.f32 %v4225_v48, %v2265_v26 }
 0x26b   : > { %2547 = vst [vmem:[%s3631_s13 + $0x2b8] sm:$0xff] %v2338_v22 }
 0x26c   : > { %2578 = vst [vmem:[%s3631_s13 + $0x3b0] sm:$0xff] %v2431_v23 }
 0x26d   : > { %2523 = vst [vmem:[%s3631_s13 + $0x1f8] sm:$0xff] %v2266_v37 }
 0x270   : > { %v2340_v53 = vpop.f32.mrf.mxu2  ;;  %v2433_v31 = vpop.f32.mrf.mxu3 }
 0x271   : > { %v2341_v58 = vadd.f32 %v4225_v48, %v2340_v53  ;;  %v2434_v44 = vadd.f32 %v4225_v48, %v2433_v31 }
 0x273   : > { %2548 = vst [vmem:[%s3631_s13 + $0x2c0] sm:$0xff] %v2341_v58 }
 0x274   : > { %2579 = vst [vmem:[%s3631_s13 + $0x3b8] sm:$0xff] %v2434_v44 }
 0x278   : > { %v2343_v14 = vpop.f32.mrf.mxu2  ;;  %v2436_v36 = vpop.f32.mrf.mxu3 }
 0x279   : > { %v2344_v34 = vadd.f32 %v4225_v48, %v2343_v14  ;;  %v2437_v29 = vadd.f32 %v4225_v48, %v2436_v36 }
 0x27b   : > { %2549 = vst [vmem:[%s3631_s13 + $0x2c8] sm:$0xff] %v2344_v34 }
 0x27c   : > { %2580 = vst [vmem:[%s3631_s13 + $0x3c0] sm:$0xff] %v2437_v29 }
 0x280   : > { %v2346_v46 = vpop.f32.mrf.mxu2  ;;  %v2439_v19 = vpop.f32.mrf.mxu3 }
 0x281   : > { %v2347_v13 = vadd.f32 %v4225_v48, %v2346_v46  ;;  %v2440_v41 = vadd.f32 %v4225_v48, %v2439_v19 }
 0x283   : > { %2550 = vst [vmem:[%s3631_s13 + $0x2d0] sm:$0xff] %v2347_v13 }
 0x284   : > { %2581 = vst [vmem:[%s3631_s13 + $0x3c8] sm:$0xff] %v2440_v41 }
 0x288   : > { %v2349_v39 = vpop.f32.mrf.mxu2  ;;  %v2442_v47 = vpop.f32.mrf.mxu3 }
 0x289   : > { %v2350_v57 = vadd.f32 %v4225_v48, %v2349_v39  ;;  %v2443_v51 = vadd.f32 %v4225_v48, %v2442_v47 }
 0x28b   : > { %2551 = vst [vmem:[%s3631_s13 + $0x2d8] sm:$0xff] %v2350_v57 }
 0x28c   : > { %2582 = vst [vmem:[%s3631_s13 + $0x3d0] sm:$0xff] %v2443_v51 }
 0x290   : > { %v2352_v33 = vpop.f32.mrf.mxu2  ;;  %v2445_v55 = vpop.f32.mrf.mxu3 }
 0x291   : > { %v2353_v2 = vadd.f32 %v4225_v48, %v2352_v33  ;;  %v2446_v3 = vadd.f32 %v4225_v48, %v2445_v55 }
 0x293   : > { %2552 = vst [vmem:[%s3631_s13 + $0x2e0] sm:$0xff] %v2353_v2 }
 0x294   : > { %2583 = vst [vmem:[%s3631_s13 + $0x3d8] sm:$0xff] %v2446_v3 }
 0x298   : > { %v2355_v63 = vpop.f32.mrf.mxu2  ;;  %v2448_v27 = vpop.f32.mrf.mxu3 }
 0x299   : > { %v2356_v24 = vadd.f32 %v4225_v48, %v2355_v63  ;;  %v2449_v12 = vadd.f32 %v4225_v48, %v2448_v27 }
 0x29b   : > { %2553 = vst [vmem:[%s3631_s13 + $0x2e8] sm:$0xff] %v2356_v24 }
 0x29c   : > { %2584 = vst [vmem:[%s3631_s13 + $0x3e0] sm:$0xff] %v2449_v12 }
 0x2a0   : > { %v2358_v56 = vpop.f32.mrf.mxu2  ;;  %v2451_v43 = vpop.f32.mrf.mxu3 }
 0x2a1   : > { %v2359_v40 = vadd.f32 %v4225_v48, %v2358_v56  ;;  %v2452_v35 = vadd.f32 %v4225_v48, %v2451_v43 }
 0x2a3   : > { %2554 = vst [vmem:[%s3631_s13 + $0x2f0] sm:$0xff] %v2359_v40 }
 0x2a4   : > { %2585 = vst [vmem:[%s3631_s13 + $0x3e8] sm:$0xff] %v2452_v35 }
 0x2a8   : > { %v2361_v0 = vpop.f32.mrf.mxu2  ;;  %v2454_v25 = vpop.f32.mrf.mxu3 }
 0x2a9   : > { %v2362_v50 = vadd.f32 %v4225_v48, %v2361_v0  ;;  %v2455_v30 = vadd.f32 %v4225_v48, %v2454_v25 }
 0x2ab   : > { %2555 = vst [vmem:[%s3631_s13 + $0x2f8] sm:$0xff] %v2362_v50 }
 0x2ac   : > { %2586 = vst [vmem:[%s3631_s13 + $0x3f0] sm:$0xff] %v2455_v30 }
 0x2af   : > { %2595 = sbr.rel (!%p3286_p5) target bundleno = 723 (0x2d3), region = 44 }
 0x2b0   : > { %v2457_v21 = vpop.f32.mrf.mxu3 }
 0x2b1   : > { %v2458_v49 = vadd.f32 %v4225_v48, %v2457_v21 }
 0x2b3   : > { %2587 = vst [vmem:[%s3631_s13 + $0x3f8] sm:$0xff] %v2458_v49 }
 0x2b4   : > { %s4420_s14 = smov (!%p2598_p11, %s2597_s14), 128 }
 0x2b5   : > { %s2810_s15 = sshll.u32 %s4420_s14, 3 }
 0x2b6   : > { %s2601_s16 = ssub.s32 1024, %s2810_s15 }
 0x2b7   : > { %s2602_s17 = sshll.u32 %s2601_s16, 4 }
 0x2b8   : > { %2603 = vsyncadd %s4345_s12, %s2602_s17  ;;  %p4354_p12 = scmp.ne.s32.totalorder %s2810_s15, 0  ;;  %s2817_s28 = sshll.u32 %s3269_s22, 10 }
 0x2b9   : > { %s2606_s23 = scalar_lea.hbm %s4411_s5, %s2817_s28  ;;  %s2608_s25 = sshll.u32 %s3631_s13, 4  ;;  %s4363_s25 = int_to_ptr.vmem [resolvable:$true] %s2608_s25 }
 0x2ba   : > { %s2610_s26 = sshll.u32 %s2606_s23, 4  ;;  %s2814_s6 = sshll.u32 %s4420_s14, 7  ;;  %s4365_s26 = int_to_ptr.hbm [resolvable:$true] %s2610_s26 }
 0x2bb   : > { %s3139_s7 = sshra.s32 %s4363_s25, 4  ;;  %s3141_s9 = sshrl.u32 %s2814_s6, 4  ;;  %s3140_s7 = int_to_ptr.vmem [resolvable:$true] %s3139_s7 }
 0x2bc   : > { %s3146_s11 = scalar_lea.vmem %s3140_s7, %s3141_s9  ;;  %s3215_s22 = smov [#allocation2]  }
 0x2bd   : > { %p3147_p13 = scmp.ne.s32.totalorder %s3140_s7, %s3146_s11  ;;  %s3150_s15 = scalar_lea.vmem %s3215_s22, 2048 }
 0x2be   : > { %p3152_p2 = scmp.lt.s32.totalorder %s3150_s15, %s3146_s11 }
 0x2bf   : > { %p3148_p0 = pnand %p3147_p13, %p4354_p12 }
 0x2c1   : > { %p3149_p1 = pneg %p3148_p0 }
 0x2c3   : > { %p3154_p3 = pnand %p3152_p2, %p3149_p1 }
 0x2c5   : > { %3157 = shalt.err (!%p3154_p3)
}
 0x2c6   : > { %s3158_s13 = sshra.s32 %s4365_s26, 4  ;;  %s3169_s10 = scalar_lea.hbm %s4411_s5, 2000  ;;  %s3159_s13 = int_to_ptr.hbm [resolvable:$true] %s3158_s13 }
 0x2c7   : > { %s3165_s16 = scalar_lea.hbm %s3159_s13, %s3141_s9  ;;  %p3170_p8 = scmp.lt.s32.totalorder %s3159_s13, %s4411_s5 }
 0x2c8   : > { %p3166_p4 = scmp.ne.s32.totalorder %s3159_s13, %s3165_s16  ;;  %p3171_p9 = scmp.lt.s32.totalorder %s3169_s10, %s3165_s16 }
 0x2ca   : > { %p3167_p5 = pnand %p3166_p4, %p4354_p12  ;;  %p3172_p10 = por %p3171_p9, %p3170_p8 }
 0x2cc   : > { %p3168_p7 = pneg %p3167_p5 }
 0x2ce   : > { %p3173_p11 = pnand %p3172_p10, %p3168_p7 }
 0x2d0   : > { %3176 = shalt.err (!%p3173_p11)
}
 0x2d1   : > { %s3216_s7 = smov 128   ;;  %s3217_s9 = smov 8  }
 0x2d2   : > { %2616 = dma.vmem_to_hbm [thread:$0]  (%p4354_p12), %s4363_s25, %s2814_s6, %s4365_s26, %s4345_s12, %s3216_s7, %s3216_s7, %s3217_s9  }
 0x2d3 PF: > { %p2835_p13 = scmp.ge.s32.totalorder %s3212_s21, 2  ;;  %s2625_s11 = sand.u32 1, %s3200_s18  }
 0x2d4   : > { %s2626_s22 = scalar_lea.sflag [#allocation3], %s2625_s11 }
 0x2d5   : > { %p2832_p0 = pnand %p2835_p13, %p3290_p6 }
 0x2d7   : > { %p2833_p1 = pneg %p2832_p0 }
 0x2d9   : > { %3195 = dma.done.wait (%p2833_p1), %s2626_s22, 16384  }
 0x2da   : > { %3197 = vsyncadd (%p2833_p1), %s2626_s22, 4294950912  ;;  %p15_p2 = scmp.ge.s32.totalorder %s3273_s24, 4   ;;  %s4415_s18 = smov %s3204_s19 }
 0x2db   : > { %s4416_s19 = smov %s3208_s20  ;;  %s4417_s20 = smov %s3284_s27 }
 0x2dc   : > { %s4418_s21 = smov %s3273_s24  ;;  %17 = sbr.rel (!%p15_p2) target bundleno = 3 (0x3), region = 75 }
 0x2e1   :  { %2632 = vsyncpa [#allocation3], 1 }
 0x2e2   :  { %2634 = vsyncpa [#allocation3 + $0x1], 1 }

</bundles_post_ra>
